<compile_context>
chip_gen: v5e
topology: v5e:2x2
jax: 0.10.0
libtpu: 0.0.40
codegen_flags: <defaults>
</compile_context>

<pallas_src>
import jax
import jax.numpy as jnp
from jax import lax
from jax.experimental import pallas as pl
from jax.experimental.pallas import tpu as pltpu


def bottleneck_kernel(x_ref, w1_ref, b1_ref, w2_ref, b2_ref, w3_ref, b3_ref,
                      o_ref):
    # x_ref : (1, H, W, Cin)    bf16   full feature map of this batch element
    # o_ref : (1, TH, W, Cout)  f32    TH-row output tile
    _, H, W, Cin = x_ref.shape
    TH = o_ref.shape[1]
    width = w1_ref.shape[1]
    Cout = w3_ref.shape[1]

    r = pl.program_id(1)
    nrows = pl.num_programs(1)
    row0 = pl.multiple_of(r * TH, TH)

    # ---- gather TH rows + 1-row halo of the input ------------------------
    top_idx = jnp.maximum(row0 - 1, 0)
    bot_idx = jnp.minimum(row0 + TH, H - 1)
    x_top = x_ref[0, pl.ds(top_idx, 1), :, :]                  # (1,  W, Cin)
    x_mid = x_ref[0, pl.ds(row0, TH), :, :]                    # (TH, W, Cin)
    x_bot = x_ref[0, pl.ds(bot_idx, 1), :, :]                  # (1,  W, Cin)
    x_halo = jnp.concatenate([x_top, x_mid, x_bot], axis=0)    # (TH+2, W, Cin)

    # ---- conv1 (1x1, BN folded) + relu1 on TH+2 rows: one fat MXU call ----
    h1 = jnp.dot(x_halo.reshape((TH + 2) * W, Cin), w1_ref[...],
                 preferred_element_type=jnp.float32)
    h1 = jnp.maximum(h1 + b1_ref[...], 0.0)
    h1 = h1.reshape(TH + 2, W, width).astype(jnp.bfloat16)

    # zero halo rows that fall outside the image (= conv2's zero padding)
    top_keep = jnp.where(r > 0, 1.0, 0.0).astype(jnp.bfloat16)
    bot_keep = jnp.where(r < nrows - 1, 1.0, 0.0).astype(jnp.bfloat16)
    h1 = jnp.concatenate(
        [h1[0:1] * top_keep, h1[1:TH + 1], h1[TH + 1:TH + 2] * bot_keep],
        axis=0)

    # zero-pad W in-value (no scratch, no unaligned stores)
    zcol = jnp.zeros((TH + 2, 1, width), jnp.bfloat16)
    p = jnp.concatenate([zcol, h1, zcol], axis=1)              # (TH+2, W+2, width)

    # ---- conv2 (3x3, stride=1, pad=1, BN folded): im2col -> ONE matmul ----
    patches = jnp.concatenate(
        [p[dy:dy + TH, dx:dx + W, :] for dy in range(3) for dx in range(3)],
        axis=-1)                                               # (TH, W, 9*width)
    h2 = jnp.dot(patches.reshape(TH * W, 9 * width), w2_ref[...],
                 preferred_element_type=jnp.float32)
    h2 = jnp.maximum(h2 + b2_ref[...], 0.0)

    # ---- conv3 (1x1, BN folded) + residual add + relu3 --------------------
    h3 = jnp.dot(h2.astype(jnp.bfloat16), w3_ref[...],
                 preferred_element_type=jnp.float32)
    h3 = h3 + b3_ref[...]
    identity = x_mid.reshape(TH * W, Cin).astype(jnp.float32)  # Cin == Cout
    out = jnp.maximum(h3 + identity, 0.0)

    o_ref[...] = out.reshape(1, TH, W, Cout)


def _pick_row_tile(H):
    for t in (8, 7, 4, 2, 1):
        if H % t == 0:
            return t
    return 1


def fold_bn_into_conv(params):
    """Fold eval-mode BN scale into the conv weights (exact in f32)."""
    (w1, s1, b1, w2, s2, b2, w3, s3, b3) = params
    w1f = w1 * s1[None, :]                       # (Cin, width)
    w2f = w2 * s2[None, None, None, :]           # (3, 3, width, width) HWIO
    w3f = w3 * s3[None, :]                       # (width, Cout)
    return w1f, b1, w2f, b2, w3f, b3


def bottleneck_pallas(x_nhwc, params, row_tile=None):
    """Fused Bottleneck forward. x_nhwc: (N, H, W, Cin). Returns f32 NHWC."""
    w1f, b1, w2f, b2, w3f, b3 = fold_bn_into_conv(params)
    N, H, W, Cin = x_nhwc.shape
    width = w1f.shape[1]
    Cout = w3f.shape[1]
    if Cin != Cout:
        raise ValueError("identity residual requires Cin == Cout "
                         "(stride=1, downsample=None Bottleneck)")
    TH = row_tile if row_tile is not None else _pick_row_tile(H)
    if H % TH != 0:
        raise ValueError(f"row_tile={TH} must divide H={H}")

    # bf16 MXU inputs (f32 accumulation in-kernel); biases stay f32.
    xb = x_nhwc.astype(jnp.bfloat16)
    w1b = w1f.astype(jnp.bfloat16)
    w2b = w2f.reshape(9 * width, width).astype(jnp.bfloat16)  # (ky,kx,ci) flattened
    w3b = w3f.astype(jnp.bfloat16)
    b1r = b1.reshape(1, width).astype(jnp.float32)
    b2r = b2.reshape(1, width).astype(jnp.float32)
    b3r = b3.reshape(1, Cout).astype(jnp.float32)

    def full(arr):
        return pl.BlockSpec(arr.shape, lambda n, r, _nd=arr.ndim: (0,) * _nd)

    out = pl.pallas_call(
        bottleneck_kernel,
        out_shape=jax.ShapeDtypeStruct((N, H, W, Cout), jnp.float32),
        grid_spec=pltpu.PrefetchScalarGridSpec(
            num_scalar_prefetch=0,
            grid=(N, H // TH),
            in_specs=[
                pl.BlockSpec((1, H, W, Cin), lambda n, r: (n, 0, 0, 0)),
                full(w1b), full(b1r),
                full(w2b), full(b2r),
                full(w3b), full(b3r),
            ],
            out_specs=pl.BlockSpec((1, TH, W, Cout), lambda n, r: (n, r, 0, 0)),
        ),
        compiler_params=pltpu.CompilerParams(
            dimension_semantics=("parallel", "parallel"),
            vmem_limit_bytes=32 * 1024 * 1024),
    )(xb, w1b, b1r, w2b, b2r, w3b, b3r)
    return out


def bottleneck_pallas_nchw(x_nchw, params, row_tile=None):
    """PyTorch-layout (NCHW) compatibility shim. Prefer keeping the surrounding
    model NHWC and calling bottleneck_pallas directly: each transpose here is an
    extra full HBM read+write pass outside the kernel."""
    x = jnp.transpose(x_nchw, (0, 2, 3, 1))
    y = bottleneck_pallas(x, params, row_tile)
    return jnp.transpose(y, (0, 3, 1, 2))


def reference_forward(x_nhwc, params):
    """Pure-JAX reference with the same BN-fold / bf16-input / f32-acc policy."""
    w1f, b1, w2f, b2, w3f, b3 = fold_bn_into_conv(params)
    xb = x_nhwc.astype(jnp.bfloat16)
    h = jnp.einsum('nhwc,cd->nhwd', xb, w1f.astype(jnp.bfloat16),
                   preferred_element_type=jnp.float32)
    h = jnp.maximum(h + b1.reshape(-1), 0.0)
    h = lax.conv_general_dilated(
        h.astype(jnp.bfloat16), w2f.astype(jnp.bfloat16),
        window_strides=(1, 1), padding='SAME',
        dimension_numbers=('NHWC', 'HWIO', 'NHWC'),
        preferred_element_type=jnp.float32)
    h = jnp.maximum(h + b2.reshape(-1), 0.0)
    h = jnp.einsum('nhwc,cd->nhwd', h.astype(jnp.bfloat16),
                   w3f.astype(jnp.bfloat16),
                   preferred_element_type=jnp.float32)
    h = h + b3.reshape(-1)
    return jnp.maximum(h + xb.astype(jnp.float32), 0.0)


def make_params(key, inplanes, planes, base_width=64, groups=1, eps=1e-5):
    width = int(planes * (base_width / 64.0)) * groups
    cout = planes * 4  # Bottleneck.expansion
    ks = jax.random.split(key, 15)

    def bn_fold(kg, kb, km, kv, c):
        gamma = 1.0 + 0.1 * jax.random.normal(kg, (c,), jnp.float32)
        beta = 0.1 * jax.random.normal(kb, (c,), jnp.float32)
        rmean = 0.1 * jax.random.normal(km, (c,), jnp.float32)
        rvar = jnp.abs(jax.random.normal(kv, (c,), jnp.float32)) + 0.5
        scale = gamma / jnp.sqrt(rvar + eps)
        bias = beta - rmean * scale
        return scale, bias

    w1 = jax.random.normal(ks[0], (inplanes, width), jnp.float32) / jnp.sqrt(1.0 * inplanes)
    w2 = jax.random.normal(ks[1], (3, 3, width, width), jnp.float32) / jnp.sqrt(9.0 * width)
    w3 = jax.random.normal(ks[2], (width, cout), jnp.float32) / jnp.sqrt(1.0 * width)
    s1, b1 = bn_fold(ks[3], ks[4], ks[5], ks[6], width)
    s2, b2 = bn_fold(ks[7], ks[8], ks[9], ks[10], width)
    s3, b3 = bn_fold(ks[11], ks[12], ks[13], ks[14], cout)
    return (w1, s1, b1, w2, s2, b2, w3, s3, b3)


if __name__ == "__main__":
    key = jax.random.PRNGKey(0)
    k_x, k_p = jax.random.split(key)

    # ResNet-50 layer1-style bottleneck at a small spatial size:
    # inplanes=256, planes=64 -> width=64, Cout=256 (lane-friendly channels).
    N, inplanes, planes, H, W = 2, 256, 64, 16, 16
    x_nhwc = jax.random.normal(k_x, (N, H, W, inplanes), jnp.float32)
    params = make_params(k_p, inplanes, planes)

    out = bottleneck_pallas(x_nhwc, params)   # row_tile auto -> 8 (2 row tiles/batch)
    out = jax.block_until_ready(out)
    assert out.shape == (N, H, W, planes * 4)

    ref = reference_forward(x_nhwc, params)
    max_err = float(jnp.max(jnp.abs(out - ref)))
    assert jnp.allclose(out, ref, atol=1e-2, rtol=1e-2), \
        f"mismatch vs JAX reference (max abs err {max_err})"

    print("KERNEL_OK")
</pallas_src>

<mosaic_0001>
module attributes {stable_mosaic.version = 11 : i64} {
  func.func @bottleneck_kernel(%arg0: i32, %arg1: i32, %arg2: memref<1x16x16x256xbf16, #tpu.memory_space<vmem>>, %arg3: memref<256x64xbf16, #tpu.memory_space<vmem>>, %arg4: memref<1x64xf32, #tpu.memory_space<vmem>>, %arg5: memref<576x64xbf16, #tpu.memory_space<vmem>>, %arg6: memref<1x64xf32, #tpu.memory_space<vmem>>, %arg7: memref<64x256xbf16, #tpu.memory_space<vmem>>, %arg8: memref<1x256xf32, #tpu.memory_space<vmem>>, %arg9: memref<1x8x16x256xf32, #tpu.memory_space<vmem>>) attributes {dimension_semantics = [#tpu.dimension_semantics<parallel>, #tpu.dimension_semantics<parallel>], iteration_bounds = array<i64: 2, 2>, scalar_prefetch = 0 : i64, scratch_operands = 0 : i64, tpu.core_type = #tpu.core_type<tc>, window_params = [{transform_indices = @transform_0, window_bounds = array<i64: 1, 16, 16, 256>}, {pipeline_mode = #tpu.pipeline_mode<synchronous>, transform_indices = @transform_1, window_bounds = array<i64: 256, 64>}, {pipeline_mode = #tpu.pipeline_mode<synchronous>, transform_indices = @transform_2, window_bounds = array<i64: 1, 64>}, {pipeline_mode = #tpu.pipeline_mode<synchronous>, transform_indices = @transform_3, window_bounds = array<i64: 576, 64>}, {pipeline_mode = #tpu.pipeline_mode<synchronous>, transform_indices = @transform_4, window_bounds = array<i64: 1, 64>}, {pipeline_mode = #tpu.pipeline_mode<synchronous>, transform_indices = @transform_5, window_bounds = array<i64: 64, 256>}, {pipeline_mode = #tpu.pipeline_mode<synchronous>, transform_indices = @transform_6, window_bounds = array<i64: 1, 256>}, {transform_indices = @transform_7, window_bounds = array<i64: 1, 8, 16, 256>}]} {
    %c8_i32 = arith.constant 8 : i32
    %0 = arith.muli %arg1, %c8_i32 : i32
    %1 = tpu.assume_multiple %0, 8 : i32
    %c1_i32 = arith.constant 1 : i32
    %2 = arith.subi %1, %c1_i32 : i32
    %c0_i32 = arith.constant 0 : i32
    %3 = arith.maxsi %2, %c0_i32 : i32
    %c8_i32_0 = arith.constant 8 : i32
    %4 = arith.addi %1, %c8_i32_0 : i32
    %c15_i32 = arith.constant 15 : i32
    %5 = arith.minsi %4, %c15_i32 : i32
    %c0 = arith.constant 0 : index
    %6 = arith.index_cast %3 : i32 to index
    %c0_1 = arith.constant 0 : index
    %c0_2 = arith.constant 0 : index
    %7 = vector.load %arg2[%c0, %6, %c0_1, %c0_2] : memref<1x16x16x256xbf16, #tpu.memory_space<vmem>>, vector<1x1x16x256xbf16>
    %8 = vector.shape_cast %7 : vector<1x1x16x256xbf16> to vector<1x16x256xbf16>
    %c0_3 = arith.constant 0 : index
    %9 = arith.index_cast %1 : i32 to index
    %c0_4 = arith.constant 0 : index
    %c0_5 = arith.constant 0 : index
    %10 = vector.load %arg2[%c0_3, %9, %c0_4, %c0_5] : memref<1x16x16x256xbf16, #tpu.memory_space<vmem>>, vector<1x8x16x256xbf16>
    %11 = vector.shape_cast %10 : vector<1x8x16x256xbf16> to vector<8x16x256xbf16>
    %c0_6 = arith.constant 0 : index
    %12 = arith.index_cast %5 : i32 to index
    %c0_7 = arith.constant 0 : index
    %c0_8 = arith.constant 0 : index
    %13 = vector.load %arg2[%c0_6, %12, %c0_7, %c0_8] : memref<1x16x16x256xbf16, #tpu.memory_space<vmem>>, vector<1x1x16x256xbf16>
    %14 = vector.shape_cast %13 : vector<1x1x16x256xbf16> to vector<1x16x256xbf16>
    %15 = tpu.concatenate %8, %11, %14 in 0 : vector<1x16x256xbf16>, vector<8x16x256xbf16>, vector<1x16x256xbf16> -> vector<10x16x256xbf16>
    %16 = vector.shape_cast %15 : vector<10x16x256xbf16> to vector<160x256xbf16>
    %c0_9 = arith.constant 0 : index
    %c0_10 = arith.constant 0 : index
    %17 = vector.load %arg3[%c0_9, %c0_10] : memref<256x64xbf16, #tpu.memory_space<vmem>>, vector<256x64xbf16>
    %cst = arith.constant dense<0.000000e+00> : vector<160x64xf32>
    %18 = tpu.matmul %16, %17, %cst {dimension_numbers = #tpu.dot_dimension_numbers<[1], [0], [0], [1], [0, 0, 1, 1], [], []>} : vector<160x256xbf16>, vector<256x64xbf16>, vector<160x64xf32> -> vector<160x64xf32>
    %c0_11 = arith.constant 0 : index
    %c0_12 = arith.constant 0 : index
    %19 = vector.load %arg4[%c0_11, %c0_12] : memref<1x64xf32, #tpu.memory_space<vmem>>, vector<1x64xf32>
    %20 = vector.broadcast %19 : vector<1x64xf32> to vector<160x64xf32>
    %21 = arith.addf %18, %20 : vector<160x64xf32>
    %cst_13 = arith.constant 0.000000e+00 : f32
    %22 = vector.broadcast %cst_13 : f32 to vector<160x64xf32>
    %23 = arith.maximumf %21, %22 : vector<160x64xf32>
    %24 = vector.shape_cast %23 : vector<160x64xf32> to vector<10x16x64xf32>
    %25 = arith.truncf %24 : vector<10x16x64xf32> to vector<10x16x64xbf16>
    %c0_i32_14 = arith.constant 0 : i32
    %26 = arith.cmpi sgt, %arg1, %c0_i32_14 : i32
    %cst_15 = arith.constant 1.000000e+00 : f32
    %cst_16 = arith.constant 0.000000e+00 : f32
    %27 = arith.select %26, %cst_15, %cst_16 : f32
    %28 = arith.truncf %27 : f32 to bf16
    %c1_i32_17 = arith.constant 1 : i32
    %29 = arith.cmpi slt, %arg1, %c1_i32_17 : i32
    %cst_18 = arith.constant 1.000000e+00 : f32
    %cst_19 = arith.constant 0.000000e+00 : f32
    %30 = arith.select %29, %cst_18, %cst_19 : f32
    %31 = arith.truncf %30 : f32 to bf16
    %32 = vector.extract_strided_slice %25 {offsets = [0, 0, 0], sizes = [1, 16, 64], strides = [1, 1, 1]} : vector<10x16x64xbf16> to vector<1x16x64xbf16>
    %33 = vector.broadcast %28 : bf16 to vector<1x16x64xbf16>
    %34 = arith.mulf %32, %33 : vector<1x16x64xbf16>
    %35 = vector.extract_strided_slice %25 {offsets = [1, 0, 0], sizes = [8, 16, 64], strides = [1, 1, 1]} : vector<10x16x64xbf16> to vector<8x16x64xbf16>
    %36 = vector.extract_strided_slice %25 {offsets = [9, 0, 0], sizes = [1, 16, 64], strides = [1, 1, 1]} : vector<10x16x64xbf16> to vector<1x16x64xbf16>
    %37 = vector.broadcast %31 : bf16 to vector<1x16x64xbf16>
    %38 = arith.mulf %36, %37 : vector<1x16x64xbf16>
    %39 = tpu.concatenate %34, %35, %38 in 0 : vector<1x16x64xbf16>, vector<8x16x64xbf16>, vector<1x16x64xbf16> -> vector<10x16x64xbf16>
    %cst_20 = arith.constant 0.000000e+00 : bf16
    %40 = vector.broadcast %cst_20 : bf16 to vector<10x1x64xbf16>
    %41 = tpu.concatenate %40, %39, %40 in 1 : vector<10x1x64xbf16>, vector<10x16x64xbf16>, vector<10x1x64xbf16> -> vector<10x18x64xbf16>
    %42 = vector.extract_strided_slice %41 {offsets = [0, 0, 0], sizes = [8, 16, 64], strides = [1, 1, 1]} : vector<10x18x64xbf16> to vector<8x16x64xbf16>
    %43 = vector.extract_strided_slice %41 {offsets = [0, 1, 0], sizes = [8, 16, 64], strides = [1, 1, 1]} : vector<10x18x64xbf16> to vector<8x16x64xbf16>
    %44 = vector.extract_strided_slice %41 {offsets = [0, 2, 0], sizes = [8, 16, 64], strides = [1, 1, 1]} : vector<10x18x64xbf16> to vector<8x16x64xbf16>
    %45 = vector.extract_strided_slice %41 {offsets = [1, 0, 0], sizes = [8, 16, 64], strides = [1, 1, 1]} : vector<10x18x64xbf16> to vector<8x16x64xbf16>
    %46 = vector.extract_strided_slice %41 {offsets = [1, 1, 0], sizes = [8, 16, 64], strides = [1, 1, 1]} : vector<10x18x64xbf16> to vector<8x16x64xbf16>
    %47 = vector.extract_strided_slice %41 {offsets = [1, 2, 0], sizes = [8, 16, 64], strides = [1, 1, 1]} : vector<10x18x64xbf16> to vector<8x16x64xbf16>
    %48 = vector.extract_strided_slice %41 {offsets = [2, 0, 0], sizes = [8, 16, 64], strides = [1, 1, 1]} : vector<10x18x64xbf16> to vector<8x16x64xbf16>
    %49 = vector.extract_strided_slice %41 {offsets = [2, 1, 0], sizes = [8, 16, 64], strides = [1, 1, 1]} : vector<10x18x64xbf16> to vector<8x16x64xbf16>
    %50 = vector.extract_strided_slice %41 {offsets = [2, 2, 0], sizes = [8, 16, 64], strides = [1, 1, 1]} : vector<10x18x64xbf16> to vector<8x16x64xbf16>
    %51 = tpu.concatenate %42, %43, %44, %45, %46, %47, %48, %49, %50 in 2 : vector<8x16x64xbf16>, vector<8x16x64xbf16>, vector<8x16x64xbf16>, vector<8x16x64xbf16>, vector<8x16x64xbf16>, vector<8x16x64xbf16>, vector<8x16x64xbf16>, vector<8x16x64xbf16>, vector<8x16x64xbf16> -> vector<8x16x576xbf16>
    %52 = vector.shape_cast %51 : vector<8x16x576xbf16> to vector<128x576xbf16>
    %c0_21 = arith.constant 0 : index
    %c0_22 = arith.constant 0 : index
    %53 = vector.load %arg5[%c0_21, %c0_22] : memref<576x64xbf16, #tpu.memory_space<vmem>>, vector<576x64xbf16>
    %cst_23 = arith.constant dense<0.000000e+00> : vector<128x64xf32>
    %54 = tpu.matmul %52, %53, %cst_23 {dimension_numbers = #tpu.dot_dimension_numbers<[1], [0], [0], [1], [0, 0, 1, 1], [], []>} : vector<128x576xbf16>, vector<576x64xbf16>, vector<128x64xf32> -> vector<128x64xf32>
    %c0_24 = arith.constant 0 : index
    %c0_25 = arith.constant 0 : index
    %55 = vector.load %arg6[%c0_24, %c0_25] : memref<1x64xf32, #tpu.memory_space<vmem>>, vector<1x64xf32>
    %56 = vector.broadcast %55 : vector<1x64xf32> to vector<128x64xf32>
    %57 = arith.addf %54, %56 : vector<128x64xf32>
    %cst_26 = arith.constant 0.000000e+00 : f32
    %58 = vector.broadcast %cst_26 : f32 to vector<128x64xf32>
    %59 = arith.maximumf %57, %58 : vector<128x64xf32>
    %60 = arith.truncf %59 : vector<128x64xf32> to vector<128x64xbf16>
    %c0_27 = arith.constant 0 : index
    %c0_28 = arith.constant 0 : index
    %61 = vector.load %arg7[%c0_27, %c0_28] : memref<64x256xbf16, #tpu.memory_space<vmem>>, vector<64x256xbf16>
    %cst_29 = arith.constant dense<0.000000e+00> : vector<128x256xf32>
    %62 = tpu.matmul %60, %61, %cst_29 {dimension_numbers = #tpu.dot_dimension_numbers<[1], [0], [0], [1], [0, 0, 1, 1], [], []>} : vector<128x64xbf16>, vector<64x256xbf16>, vector<128x256xf32> -> vector<128x256xf32>
    %c0_30 = arith.constant 0 : index
    %c0_31 = arith.constant 0 : index
    %63 = vector.load %arg8[%c0_30, %c0_31] : memref<1x256xf32, #tpu.memory_space<vmem>>, vector<1x256xf32>
    %64 = vector.broadcast %63 : vector<1x256xf32> to vector<128x256xf32>
    %65 = arith.addf %62, %64 : vector<128x256xf32>
    %66 = vector.shape_cast %11 : vector<8x16x256xbf16> to vector<128x256xbf16>
    %67 = arith.extf %66 : vector<128x256xbf16> to vector<128x256xf32>
    %68 = arith.addf %65, %67 : vector<128x256xf32>
    %cst_32 = arith.constant 0.000000e+00 : f32
    %69 = vector.broadcast %cst_32 : f32 to vector<128x256xf32>
    %70 = arith.maximumf %68, %69 : vector<128x256xf32>
    %71 = vector.shape_cast %70 : vector<128x256xf32> to vector<1x8x16x256xf32>
    %c0_33 = arith.constant 0 : index
    %c0_34 = arith.constant 0 : index
    %c0_35 = arith.constant 0 : index
    %c0_36 = arith.constant 0 : index
    %72 = vector.load %arg9[%c0_33, %c0_34, %c0_35, %c0_36] : memref<1x8x16x256xf32, #tpu.memory_space<vmem>>, vector<1x8x16x256xf32>
    tpu.vector_store %arg9[%c0_33, %c0_34, %c0_35, %c0_36], %71 {strides = array<i32>} : memref<1x8x16x256xf32, #tpu.memory_space<vmem>>, vector<1x8x16x256xf32>,
    return
  }
  func.func @transform_0(%arg0: i32, %arg1: i32) -> (i32, i32, i32, i32) {
    %c0_i32 = arith.constant 0 : i32
    %c0_i32_0 = arith.constant 0 : i32
    %c0_i32_1 = arith.constant 0 : i32
    %c0_i32_2 = arith.constant 0 : i32
    return %arg0, %c0_i32, %c0_i32_0, %c0_i32_1 : i32, i32, i32, i32
  }
  func.func @transform_1(%arg0: i32, %arg1: i32) -> (i32, i32) {
    %c0_i32 = arith.constant 0 : i32
    %c0_i32_0 = arith.constant 0 : i32
    %c0_i32_1 = arith.constant 0 : i32
    return %c0_i32, %c0_i32_0 : i32, i32
  }
  func.func @transform_2(%arg0: i32, %arg1: i32) -> (i32, i32) {
    %c0_i32 = arith.constant 0 : i32
    %c0_i32_0 = arith.constant 0 : i32
    %c0_i32_1 = arith.constant 0 : i32
    return %c0_i32, %c0_i32_0 : i32, i32
  }
  func.func @transform_3(%arg0: i32, %arg1: i32) -> (i32, i32) {
    %c0_i32 = arith.constant 0 : i32
    %c0_i32_0 = arith.constant 0 : i32
    %c0_i32_1 = arith.constant 0 : i32
    return %c0_i32, %c0_i32_0 : i32, i32
  }
  func.func @transform_4(%arg0: i32, %arg1: i32) -> (i32, i32) {
    %c0_i32 = arith.constant 0 : i32
    %c0_i32_0 = arith.constant 0 : i32
    %c0_i32_1 = arith.constant 0 : i32
    return %c0_i32, %c0_i32_0 : i32, i32
  }
  func.func @transform_5(%arg0: i32, %arg1: i32) -> (i32, i32) {
    %c0_i32 = arith.constant 0 : i32
    %c0_i32_0 = arith.constant 0 : i32
    %c0_i32_1 = arith.constant 0 : i32
    return %c0_i32, %c0_i32_0 : i32, i32
  }
  func.func @transform_6(%arg0: i32, %arg1: i32) -> (i32, i32) {
    %c0_i32 = arith.constant 0 : i32
    %c0_i32_0 = arith.constant 0 : i32
    %c0_i32_1 = arith.constant 0 : i32
    return %c0_i32, %c0_i32_0 : i32, i32
  }
  func.func @transform_7(%arg0: i32, %arg1: i32) -> (i32, i32, i32, i32) {
    %c0_i32 = arith.constant 0 : i32
    %c0_i32_0 = arith.constant 0 : i32
    %c0_i32_1 = arith.constant 0 : i32
    return %arg0, %arg1, %c0_i32, %c0_i32_0 : i32, i32, i32, i32
  }
}

</mosaic_0001>

<bundles_post_ra>
// kernel: tpu_custom_call.1
= control target key start
LH: loop header
LB: loop body
LE: loop exit
PB: predicated region body
PF: predicated region fallthrough
CT: control target
= control target key end

     0   :  { %s4059_s0 = inlined_call_operand.hbm [shape: bf16[2,16,16,256], index: 0, kind: input, shape index: {}]   ;;  %s4060_s1 = inlined_call_operand.vmem [shape: bf16[256,64], index: 1, kind: input, shape index: {}]   ;;  %s4061_s2 = inlined_call_operand.vmem [shape: f32[1,64], index: 2, kind: input, shape index: {}]   ;;  %s4062_s3 = inlined_call_operand.vmem [shape: bf16[576,64], index: 3, kind: input, shape index: {}]   ;;  %s4063_s4 = inlined_call_operand.vmem [shape: f32[1,64], index: 4, kind: input, shape index: {}]   ;;  %s4064_s5 = inlined_call_operand.vmem [shape: bf16[64,256], index: 5, kind: input, shape index: {}]   ;;  %s4065_s6 = inlined_call_operand.vmem [shape: f32[1,256], index: 6, kind: input, shape index: {}]   ;;  %s4066_s7 = inlined_call_operand.hbm [shape: f32[2,16,16,256], index: 7, kind: output, shape index: {}]  }
   0x1   :  { %4074 = sst [smem:[#allocation15_spill]] %s4066_s7 }
   0x2   :  { %12 = vsyncpa [#allocation3], 0 }
   0x3   :  { %14 = vsyncpa [#allocation3 + $0x1], 0 }
   0x4   :  { %15 = vsyncpa [#allocation4], 0 }
   0x5   :  { %17 = vsyncpa [#allocation4 + $0x1], 0  ;;  %s3051_s24 = smov 0   ;;  %s3053_s25 = smov 0  }
   0x6   :  { %s3055_s26 = smov 0   ;;  %s3057_s27 = smov 0  }
   0x7   :  { %s3059_s28 = smov 0   ;;  %s3061_s29 = smov 0  }
   0x8   :  { %s3063_s30 = smov 0   ;;  %s3065_s8 = smov 0  }
   0x9   :  { %s3067_s9 = smov 0   ;;  %s3069_s10 = smov 0  }
   0xa   :  { %s3071_s11 = smov 0  }
   0xb LB: > { %4075 = sst [smem:[#allocation8_spill]] %s2996_s9  ;;  %s2264_s12 = sadd.s32 4294967295, %s3004_s11   ;;  %s3004_s11 = sphi %s3071_s11, %s23_s11   ;;  %s3000_s10 = sphi %s3069_s10, %s4095_s10   ;;  %s2996_s9 = sphi %s3067_s9, %s4094_s9   ;;  %s2992_s8 = sphi %s3065_s8, %s4093_s8   ;;  %s2988_s30 = sphi %s3063_s30, %s4092_s30   ;;  %s2984_s29 = sphi %s3061_s29, %s4101_s29   ;;  %s2980_s28 = sphi %s3059_s28, %s4100_s28   ;;  %s2976_s27 = sphi %s3057_s27, %s4099_s27   ;;  %s2972_s26 = sphi %s3055_s26, %s4098_s26   ;;  %s2968_s25 = sphi %s3053_s25, %s4097_s25   ;;  %s2964_s24 = sphi %s3051_s24, %s4096_s24  }
   0xc   : > { %4076 = sst [smem:[#allocation9_spill]] %s3000_s10  ;;  %s2265_s13 = sadd.s32 4294967294, %s3004_s11  }
   0xd   : > { %s32_s14 = sadd.s32 1, %s2996_s9  ;;  %s35_s15 = sadd.s32 1, %s3000_s10 }
   0xe   : > { %p33_p0 = scmp.ge.s32.totalorder %s32_s14, 2  ;;  %s42_s16 = sadd.s32 1, %s2984_s29 }
   0xf   : > { %p49_p1 = scmp.ne.s32.totalorder %s2984_s29, %s2980_s28  ;;  %p50_p2 = scmp.eq.s32.totalorder %s3004_s11, 0 }
  0x10   : > { %s4103_s14 = smov (%p33_p0, %s32_s14), 0  ;;  %s4105_s15 = smov (!%p33_p0, %s35_s15), %s3000_s10 }
  0x11   : > { %4077 = sst [smem:[#allocation10_spill]] %s4103_s14  ;;  %p3115_p3 = por %p50_p2, %p49_p1 }
  0x12   : > { %p55_p4 = scmp.ne.s32.totalorder %s2980_s28, %s2976_s27  ;;  %p37_p5 = scmp.ge.s32.totalorder %s4105_s15, 2 }
  0x13   : > { %p56_p6 = scmp.eq.s32.totalorder %s2264_s12, 0  ;;  %s192_s18 = ssub.s32 %s2996_s9, %s4103_s14 }
  0x14   : > { %s196_s19 = sadd.s32 1, %s2972_s26  ;;  %s4107_s15 = smov (%p37_p5, %s4105_s15), 0 }
  0x15   : > { %4079 = sst [smem:[#allocation11_spill]] %s4107_s15  ;;  %p3125_p7 = por %p56_p6, %p55_p4 }
  0x16   : > { %p206_p8 = scmp.ne.s32.totalorder %s2972_s26, %s2968_s25  ;;  %s39_s21 = ssub.s32 %s3000_s10, %s4107_s15 }
  0x17   : > { %p207_p9 = scmp.eq.s32.totalorder %s2264_s12, 3  ;;  %p40_p10 = scmp.eq.s32.totalorder %s39_s21, 0 }
  0x18   : > { %s193_s22 = sor.u32 %s192_s18, %s39_s21  ;;  %p212_p13 = scmp.ne.s32.totalorder %s2968_s25, %s2964_s24 }
  0x19   : > { %p194_p11 = scmp.eq.s32.totalorder %s193_s22, 0  ;;  %p3133_p12 = por %p207_p9, %p206_p8 }
  0x1a   : > { %s3138_s27 = scalar_select %p40_p10, %s2984_s29, %s42_s16  }
  0x1b   : > { %s4081_s23 = scalar_select %p3133_p12, 1, 0 }
  0x1c   : > { %4083 = sst [smem:[#allocation13_spill]] %s3138_s27  ;;  %p213_p0 = scmp.eq.s32.totalorder %s2265_s13, 3 }
  0x1d   : > { %4082 = sst [smem:[#allocation12_spill]] %s4081_s23  ;;  %p2755_p1 = scmp.lt.s32.totalorder %s3004_s11, 4 }
  0x1e   : > { %s3141_s14 = scalar_select %p194_p11, %s2972_s26, %s196_s19  }
  0x1f   : > { %p3146_p2 = por %p213_p0, %p212_p13  ;;  %s251_s12 = sand.u32 1, %s2984_s29  }
  0x20   : > { %4084 = sst [smem:[#allocation14_spill]] %s3141_s14  ;;  %s2268_s18 = sshll.u32 %s251_s12, 8 }
  0x21   : > { %s2633_s21 = sshll.u32 %s3000_s10, 8  ;;  %s255_s16 = scalar_lea.vmem [#allocation2], %s2268_s18 }
  0x22   : > { %s260_s23 = scalar_lea.hbm %s4059_s0, %s2633_s21  ;;  %s263_s27 = sshll.u32 %s255_s16, 4  ;;  %s264_s27 = int_to_ptr.vmem [resolvable:$true] %s263_s27 }
  0x23   : > { %s261_s7 = sshll.u32 %s260_s23, 4  ;;  %p2748_p4 = pnand %p2755_p1, %p3115_p3  ;;  %s262_s7 = int_to_ptr.hbm [resolvable:$true] %s261_s7 }
  0x24   : > { %p2271_p5 = scmp.ge.s32.totalorder %s3004_s11, 1  ;;  %s252_s13 = scalar_lea.sflag [#allocation3], %s251_s12 }
  0x25   : > { %s3006_s19 = smov 128   ;;  %s3007_s14 = smov 8  }
  0x26   : > { %2750 = dma.hbm_to_vmem [thread:$0]  (!%p2748_p4), %s262_s7, 4096, %s264_s27, %s252_s13, %s3006_s19, %s3006_s19, %s3007_s14  }
  0x27   : > { %p271_p6 = scmp.lt.s32.totalorder %s3004_s11, 5 }
  0x29   : > { %p272_p8 = pnand %p2271_p5, %p271_p6 }
  0x2a   : > { %s277_s10 = sand.u32 (!%p272_p8), 1, %s2980_s28  }
  0x2b   : > { %275 = sbr.rel (%p272_p8) target bundleno = 1023 (0x3ff), region = 48  ;;  %s2272_s15 = sshll.u32 (!%p272_p8), %s277_s10, 8 }
  0x2c   : > { %s278_s21 = scalar_lea.sflag (!%p272_p8), [#allocation3], %s277_s10  ;;  %s3160_s18 = scalar_lea.vmem (!%p272_p8), [#allocation2], %s2272_s15 }
  0x30   : > { %2955 = dma.done.wait (%p3125_p7), %s278_s21, 4096  }
  0x31   : > { %2957 = vsyncadd (%p3125_p7), %s278_s21, 4294963200  ;;  %v2665_v0 = vld [vmem:[%s4060_s1 + $0x38] sm:$0xff]  ;;  %v2664_v2 = vld [vmem:[%s4060_s1 + $0x30] sm:$0xff]  ;;  %s2274_s20 = sshll.u32 %s2988_s30, 3  ;;  %vm927_vm0 = vcmask 1040384   ;;  %p741_p9 = scmp.gt.s32.totalorder %s2988_s30, 0 }
  0x32   : > { %v2673_v1 = vld [vmem:[%s4060_s1 + $0x78] sm:$0xff]  ;;  %583 = vmatpush.bf16.msra.mxu0 %v2665_v0  ;;  %v2672_v3 = vld [vmem:[%s4060_s1 + $0x70] sm:$0xff]  ;;  %v2663_v4 = vld [vmem:[%s4060_s1 + $0x28] sm:$0xff]  ;;  %s2275_s21 = sadd.s32 4294967295, %s2274_s20  ;;  %s319_s23 = sadd.s32 8, %s2274_s20  ;;  %vm1079_vm4 = vcmask 1046528  }
  0x33   : > { %642 = vmatpush.bf16.msra.mxu1 %v2673_v1  ;;  %v2671_v5 = vld [vmem:[%s4060_s1 + $0x68] sm:$0xff]  ;;  %v2662_v6 = vld [vmem:[%s4060_s1 + $0x20] sm:$0xff]  ;;  %p317_p3 = scmp.gt.s32.totalorder %s2275_s21, 0  ;;  %v2661_v8 = vld [vmem:[%s4060_s1 + $0x18] sm:$0xff]  ;;  %vm928_vm1 = vsmask.f32 256 }
  0x34   : > { %v2670_v7 = vld [vmem:[%s4060_s1 + $0x60] sm:$0xff]  ;;  %v2669_v9 = vld [vmem:[%s4060_s1 + $0x58] sm:$0xff]  ;;  %v2660_v10 = vld [vmem:[%s4060_s1 + $0x10] sm:$0xff]  ;;  %p320_p7 = scmp.lt.s32.totalorder %s319_s23, 15  ;;  %s3008_s20 = smov 64   ;;  %vm1174_vm5 = vcmask 523264  }
  0x35   : > { %s4109_s21 = smov (!%p317_p3, %s2275_s21), 0  ;;  %v2668_v11 = vld [vmem:[%s4060_s1 + $0x50] sm:$0xff]  ;;  %v2659_v12 = vld [vmem:[%s4060_s1 + $0x8] sm:$0xff]  ;;  %v2658_v14 = vld [vmem:[%s4060_s1] sm:$0xff]  ;;  %vm950_vm3 = vsmask.f32 7424 }
  0x36   : > { %584 = vmatpush.bf16.msra.mxu0 %v2664_v2  ;;  %s2634_s17 = sshll.u32 %s4109_s21, 4  ;;  %v2667_v13 = vld [vmem:[%s4060_s1 + $0x48] sm:$0xff]  ;;  %v2666_v15 = vld [vmem:[%s4060_s1 + $0x40] sm:$0xff]  ;;  %s2638_s21 = sshll.u32 %s2988_s30, 7  ;;  %vm3279_vm2 = vmand %vm927_vm0, %vm928_vm1 }
  0x37   : > { %643 = vmatpush.bf16.msra.mxu1 %v2672_v3  ;;  %s324_s27 = scalar_lea.vmem %s3160_s18, %s2634_s17 [#allocation2]  ;;  %s3220_s19 = scalar_lea.vmem %s3160_s18, %s2638_s21 [#allocation2] }
  0x38   : > { %v2284_v16 = vld [vmem:[%s324_s27] sm:$0xf]  ;;  %v2636_v17 = vld [vmem:[%s324_s27 + $0x4] sm:$0xf0]  ;;  %v2635_v18 = vld [vmem:[%s324_s27 + $0x4] sm:$0xf] }
  0x39   : > { %v2286_v19 = vld [vmem:[%s324_s27 + $0x8] sm:$0xf0]  ;;  %v2285_v20 = vor.u32 %v2636_v17, %v2284_v16  ;;  %v2292_v22 = vld [vmem:[%s3220_s19] sm:$0xf]  ;;  %v2640_v23 = vld [vmem:[%s3220_s19 + $0x4] sm:$0xf0] }
  0x3a   : > { %585 = vmatpush.bf16.msra.mxu0 %v2663_v4  ;;  %v2289_v21 = vor.u32 %v2635_v18, %v2286_v19  ;;  %v2639_v24 = vld [vmem:[%s3220_s19 + $0x4] sm:$0xf]  ;;  %v2294_v25 = vld [vmem:[%s3220_s19 + $0x8] sm:$0xf0]  ;;  %v2293_v26 = vor.u32 %v2640_v23, %v2292_v22  ;;  %v2300_v28 = vld [vmem:[%s3220_s19 + $0x10] sm:$0xf] }
  0x3b   : > { %644 = vmatpush.bf16.msra.mxu1 %v2671_v5  ;;  %v2297_v27 = vor.u32 %v2639_v24, %v2294_v25  ;;  %v2642_v29 = vld [vmem:[%s3220_s19 + $0x14] sm:$0xf0]  ;;  %v2641_v30 = vld [vmem:[%s3220_s19 + $0x14] sm:$0xf]  ;;  %v2302_v31 = vld [vmem:[%s3220_s19 + $0x18] sm:$0xf0] }
  0x3c   : > { %v2301_v32 = vor.u32 %v2642_v29, %v2300_v28  ;;  %v2305_v33 = vor.u32 %v2641_v30, %v2302_v31  ;;  %v2308_v34 = vld [vmem:[%s3220_s19 + $0x20] sm:$0xf]  ;;  %v2644_v35 = vld [vmem:[%s3220_s19 + $0x24] sm:$0xf0]  ;;  %v2643_v36 = vld [vmem:[%s3220_s19 + $0x24] sm:$0xf] }
  0x3d   : > { %v2310_v37 = vld [vmem:[%s3220_s19 + $0x28] sm:$0xf0]  ;;  %v2309_v38 = vor.u32 %v2644_v35, %v2308_v34  ;;  %v2316_v40 = vld [vmem:[%s3220_s19 + $0x30] sm:$0xf]  ;;  %v2646_v41 = vld [vmem:[%s3220_s19 + $0x34] sm:$0xf0] }
  0x3e   : > { %586 = vmatpush.bf16.msra.mxu0 %v2662_v6  ;;  %v2313_v39 = vor.u32 %v2643_v36, %v2310_v37  ;;  %v2645_v42 = vld [vmem:[%s3220_s19 + $0x34] sm:$0xf]  ;;  %v2318_v43 = vld [vmem:[%s3220_s19 + $0x38] sm:$0xf0]  ;;  %v2317_v44 = vor.u32 %v2646_v41, %v2316_v40  ;;  %v2324_v46 = vld [vmem:[%s3220_s19 + $0x40] sm:$0xf] }
  0x3f   : > { %645 = vmatpush.bf16.msra.mxu1 %v2670_v7  ;;  %v2321_v45 = vor.u32 %v2645_v42, %v2318_v43  ;;  %v2648_v47 = vld [vmem:[%s3220_s19 + $0x44] sm:$0xf0]  ;;  %v2647_v48 = vld [vmem:[%s3220_s19 + $0x44] sm:$0xf]  ;;  %v2326_v49 = vld [vmem:[%s3220_s19 + $0x48] sm:$0xf0] }
  0x40   : > { %v2325_v50 = vor.u32 %v2648_v47, %v2324_v46  ;;  %v2329_v51 = vor.u32 %v2647_v48, %v2326_v49  ;;  %v2332_v52 = vld [vmem:[%s3220_s19 + $0x50] sm:$0xf]  ;;  %v2650_v53 = vld [vmem:[%s3220_s19 + $0x54] sm:$0xf0]  ;;  %v2649_v54 = vld [vmem:[%s3220_s19 + $0x54] sm:$0xf] }
  0x41   : > { %v2334_v55 = vld [vmem:[%s3220_s19 + $0x58] sm:$0xf0]  ;;  %v2333_v56 = vor.u32 %v2650_v53, %v2332_v52  ;;  %v2340_v58 = vld [vmem:[%s3220_s19 + $0x60] sm:$0xf]  ;;  %v2652_v59 = vld [vmem:[%s3220_s19 + $0x64] sm:$0xf0] }
  0x42   : > { %587 = vmatpush.bf16.msra.mxu0 %v2661_v8  ;;  %v2337_v57 = vor.u32 %v2649_v54, %v2334_v55  ;;  %v2651_v60 = vld [vmem:[%s3220_s19 + $0x64] sm:$0xf]  ;;  %v2342_v61 = vld [vmem:[%s3220_s19 + $0x68] sm:$0xf0]  ;;  %v2341_v62 = vor.u32 %v2652_v59, %v2340_v58  ;;  %v2348_v0 = vld [vmem:[%s3220_s19 + $0x70] sm:$0xf] }
  0x43   : > { %646 = vmatpush.bf16.msra.mxu1 %v2669_v9  ;;  %v2345_v63 = vor.u32 %v2651_v60, %v2342_v61  ;;  %v2654_v1 = vld [vmem:[%s3220_s19 + $0x74] sm:$0xf0]  ;;  %v2653_v2 = vld [vmem:[%s3220_s19 + $0x74] sm:$0xf]  ;;  %v2350_v3 = vld [vmem:[%s3220_s19 + $0x78] sm:$0xf0] }
  0x44   : > { %v3257_v4 = vld [vmem:[%s4061_s2] ss:$0 sm:$0xff]  ;;  %v2349_v5 = vor.u32 %v2654_v1, %v2348_v0  ;;  %v2353_v6 = vor.u32 %v2653_v2, %v2350_v3  ;;  %s4111_s23 = smov (!%p320_p7, %s319_s23), 15  ;;  %p753_p11 = scmp.lt.s32.totalorder %s2988_s30, 1 }
  0x45   : > { %s2655_s7 = sshll.u32 %s4111_s23, 4  ;;  %v2682_v46 = vld [vmem:[%s4062_s3 + $0x40] sm:$0xff] }
  0x46   : > { %588 = vmatpush.bf16.msra.mxu0 %v2660_v10  ;;  %s3294_s14 = scalar_select %p741_p9, 1.0, 0.0 }
  0x47   : > { %647 = vmatpush.bf16.msra.mxu1 %v2668_v11  ;;  %s348_s10 = scalar_lea.vmem %s3160_s18, %s2655_s7 [#allocation2] }
  0x48   : > { %s745_s27 = sshrl.u32 %s3294_s14, 16  ;;  %v2356_v58 = vld [vmem:[%s348_s10] sm:$0xf]  ;;  %v2657_v59 = vld [vmem:[%s348_s10 + $0x4] sm:$0xf0]  ;;  %p744_p10 = scmp.ne.f32.partialorder %s3294_s14, %s3294_s14 }
  0x49   : > { %v2656_v2 = vld [vmem:[%s348_s10 + $0x4] sm:$0xf]  ;;  %v2358_v3 = vld [vmem:[%s348_s10 + $0x8] sm:$0xf0]  ;;  %s746_s12 = sand.u32 1, %s745_s27 }
  0x4a   : > { %589 = vmatpush.bf16.msra.mxu0 %v2659_v12  ;;  %s747_s18 = sadd.s32 32767, %s746_s12 }
  0x4b   : > { %648 = vmatpush.bf16.msra.mxu1 %v2667_v13  ;;  %s748_s22 = sadd.s32 %s747_s18, %s3294_s14 }
  0x4c   : > { %s749_s16 = sand.u32 4294901760, %s748_s22 }
  0x4d   : > { %s4113_s16 = smov (%p744_p10, %s749_s16), 2143289344 }
  0x4e   : > { %590 = vmatpush.bf16.msra.mxu0 %v2658_v14  ;;  %s752_s13 = sshrl.u32 %s4113_s16, 16 }
  0x4f   : > { %649 = vmatpush.bf16.msra.mxu1 %v2666_v15  ;;  %s765_s21 = sshll.u32 %s752_s13, 16 }
  0x50   : > { %s766_s15 = sor.u32 %s765_s21, %s752_s13  ;;  %s2718_s21 = sshll.u32 %s2988_s30, 5 }
  0x51   : > { %591 = vmatmul.bf16.vlgmr.msra.gmra.mxu0 %v2285_v20  ;;  %s754_s14 = scalar_select %p753_p11, 1.0, 0.0 }
  0x52   : > { %650 = vmatmul.bf16.vlgmr.msra.gmra.mxu1 %v2289_v21 }
  0x53   : > { %s757_s10 = sshrl.u32 %s754_s14, 16  ;;  %p756_p13 = scmp.ne.f32.partialorder %s754_s14, %s754_s14 }
  0x54   : > { %s758_s27 = sand.u32 1, %s757_s10 }
  0x55   : > { %s759_s12 = sadd.s32 32767, %s758_s27 }
  0x56   : > { %s760_s18 = sadd.s32 %s759_s12, %s754_s14 }
  0x57   : > { %s761_s22 = sand.u32 4294901760, %s760_s18 }
  0x58   : > { %s4115_s22 = smov (%p756_p13, %s761_s22), 2143289344 }
  0x59   : > { %s764_s16 = sshrl.u32 %s4115_s22, 16  ;;  %s310_s22 = sand.u32 1, %s2968_s25  }
  0x5a   : > { %s776_s13 = sshll.u32 %s764_s16, 16  ;;  %s2153_s27 = scalar_lea.sflag [#allocation4], %s310_s22 }
  0x5b   : > { %s777_s17 = sor.u32 %s776_s13, %s764_s16  ;;  %s2273_s16 = sshll.u32 %s310_s22, 8 }
  0x5c   : > { %s3925_s13 = scalar_lea.vmem [#allocation5], %s2273_s16 }
  0x5d   : > { %s2168_s14 = sshll.u32 %s3925_s13, 4  ;;  %s2169_s14 = int_to_ptr.vmem [resolvable:$true] %s2168_s14 }
  0x61   : > { %596 = vmatmul.bf16.gmra.mxu0 %v2293_v26 }
  0x62   : > { %655 = vmatmul.bf16.gmra.mxu1 %v2297_v27 }
  0x71   : > { %601 = vmatmul.bf16.gmra.mxu0 %v2301_v32 }
  0x72   : > { %660 = vmatmul.bf16.gmra.mxu1 %v2305_v33 }
  0x81   : > { %606 = vmatmul.bf16.gmra.mxu0 %v2309_v38 }
  0x82   : > { %665 = vmatmul.bf16.gmra.mxu1 %v2313_v39 }
  0x91   : > { %611 = vmatmul.bf16.gmra.mxu0 %v2317_v44 }
  0x92   : > { %670 = vmatmul.bf16.gmra.mxu1 %v2321_v45 }
  0xa1   : > { %616 = vmatmul.bf16.gmra.mxu0 %v2325_v50 }
  0xa2   : > { %675 = vmatmul.bf16.gmra.mxu1 %v2329_v51 }
  0xb1   : > { %621 = vmatmul.bf16.gmra.mxu0 %v2333_v56 }
  0xb2   : > { %680 = vmatmul.bf16.gmra.mxu1 %v2337_v57 }
  0xc1   : > { %626 = vmatmul.bf16.gmra.mxu0 %v2341_v62 }
  0xc2   : > { %685 = vmatmul.bf16.gmra.mxu1 %v2345_v63  ;;  %v2357_v63 = vor.u32 %v2657_v59, %v2356_v58 }
  0xce   : > { %v592_v7 = vpop.f32.mrf.mxu0 }
  0xcf   : > { %v651_v8 = vpop.f32.mrf.mxu1  ;;  %v593_v9 = vadd.f32 %v3257_v4, %v592_v7 }
  0xd1   : > { %v3260_v10 = vadd.f32 %v651_v8, %v593_v9  ;;  %631 = vmatmul.bf16.gmra.mxu0 %v2349_v5 }
  0xd2   : > { %690 = vmatmul.bf16.gmra.mxu1 %v2353_v6  ;;  %v2361_v6 = vor.u32 %v2656_v2, %v2358_v3 }
  0xd6   : > { %v3262_v11 = vpop.f32.mrf.mxu0 }
  0xd7   : > { %v3264_v12 = vpop.f32.mrf.mxu1 }
  0xde   : > { %v597_v13 = vpop.f32.mrf.mxu0 }
  0xdf   : > { %v656_v14 = vpop.f32.mrf.mxu1  ;;  %v598_v15 = vadd.f32 %v3257_v4, %v597_v13 }
  0xe1   : > { %v3267_v16 = vadd.f32 %v656_v14, %v598_v15  ;;  %636 = vmatmul.bf16.gmra.mxu0 %v2357_v63 }
  0xe2   : > { %695 = vmatmul.bf16.gmra.mxu1 %v2361_v6 }
  0xe6   : > { %v3269_v17 = vpop.f32.mrf.mxu0 }
  0xe7   : > { %v3271_v18 = vpop.f32.mrf.mxu1 }
  0xee   : > { %v602_v19 = vpop.f32.mrf.mxu0 }
  0xef   : > { %v661_v20 = vpop.f32.mrf.mxu1  ;;  %v603_v21 = vadd.f32 %v3257_v4, %v602_v19 }
  0xf1   : > { %v662_v22 = vadd.f32 %v661_v20, %v603_v21 }
  0xf3   : > { %v705_v25 = vmax.f32 %v662_v22, 0.0 }
  0xf5   : > { %v725_v28 = vpack.c.bf16 %v705_v25, %v705_v25 }
  0xf6   : > { %v604_v23 = vpop.f32.mrf.mxu0 }
  0xf7   : > { %v663_v24 = vpop.f32.mrf.mxu1  ;;  %v605_v26 = vadd.f32 %v3257_v4, %v604_v23  ;;  %v811_v33 = vunpack.c.l.b16 %v725_v28  ;;  %v595_v23 = vadd.f32 %v3257_v4, %v3262_v11 }
  0xf9   : > { %v664_v27 = vadd.f32 %v663_v24, %v605_v26  ;;  %v654_v26 = vadd.f32 %v3264_v12, %v595_v23 }
  0xfb   : > { %v706_v29 = vmax.f32 %v664_v27, 0.0 }
  0xfd   : > { %v726_v30 = vpack.c.bf16 %v706_v29, %v706_v29 }
  0xfe   : > { %v607_v31 = vpop.f32.mrf.mxu0 }
  0xff   : > { %v666_v32 = vpop.f32.mrf.mxu1  ;;  %v812_v34 = vunpack.c.l.b16 %v726_v30  ;;  %v608_v35 = vadd.f32 %v3257_v4, %v607_v31  ;;  %v702_v31 = vmax.f32 %v654_v26, 0.0 }
 0x101   : > { %v829_v36 = vpack.c.b16 %v812_v34, %v811_v33  ;;  %v667_v38 = vadd.f32 %v666_v32, %v608_v35  ;;  %v701_v34 = vmax.f32 %v3260_v10, 0.0  ;;  %v722_v35 = vpack.c.bf16 %v702_v31, %v702_v31 }
 0x103   : > { %v852_v37 = vshrl.u32 %v829_v36, 16  ;;  %v855_v40 = vshll.u32 %v829_v36, 16  ;;  %v707_v43 = vmax.f32 %v667_v38, 0.0 }
 0x105   : > { %v854_v39 = vrot.slane %v852_v37, 7  ;;  %v727_v49 = vpack.c.bf16 %v707_v43, %v707_v43  ;;  %v770_v43 = vunpack.c.l.bf16 %v722_v35 }
 0x106   : > { %v609_v41 = vpop.f32.mrf.mxu0 }
 0x107   : > { %v668_v42 = vpop.f32.mrf.mxu1  ;;  %v610_v44 = vadd.f32 %v3257_v4, %v609_v41  ;;  %v857_v45 = vor.u32 %v855_v40, %v854_v39  ;;  %v813_v54 = vunpack.c.l.b16 %v727_v49  ;;  %v3306_v7 = vsel %vm3279_vm2, %v854_v39, 0 }
 0x108   : > { %v983_v14 = vshll.u32 %v3306_v7, 16  ;;  %v721_v41 = vpack.c.bf16 %v701_v34, %v701_v34  ;;  %v703_v34 = vmax.f32 %v3267_v16, 0.0 }
 0x109   : > { %v669_v47 = vadd.f32 %v668_v42, %v610_v44  ;;  %v3285_v48 = vsel %vm3279_vm2, 0, %v857_v45  ;;  %v767_v42 = vstv %s766_s15 }
 0x10a   : > { %1107 = vrot.lane.b32.xlu2 %v3285_v48, %s3008_s20  ;;  %v978_v62 = vshll.u32 %v3285_v48, 16  ;;  %v976_v13 = vshrl.u32 %v3285_v48, 16  ;;  %v985_v22 = vrot.slane %v983_v14, 1  ;;  %v771_v45 = vunpack.c.l.bf16 %v767_v42 }
 0x10b   : > { %v708_v50 = vmax.f32 %v669_v47, 0.0  ;;  %v723_v16 = vpack.c.bf16 %v703_v34, %v703_v34 }
 0x10c   : > { %v980_v9 = vrot.slane %v978_v62, 1  ;;  %v773_v10 = vmul.f32 %v771_v45, %v770_v43 }
 0x10d   : > { %v728_v51 = vpack.c.bf16 %v708_v50, %v708_v50  ;;  %v769_v50 = vunpack.c.l.bf16 %v721_v41 }
 0x10e   : > { %v3290_v52 = vpop.f32.mrf.mxu0  ;;  %v981_v15 = vor.u32 %v980_v9, %v976_v13 }
 0x10f   : > { %v3292_v53 = vpop.f32.mrf.mxu1  ;;  %v814_v55 = vunpack.c.l.b16 %v728_v51 }
 0x110   : > { %v3323_v24 = vsel %vm950_vm3, %v981_v15, %v985_v22  ;;  %v2681_v15 = vld [vmem:[%s4062_s3 + $0x38] sm:$0xff] }
 0x111   : > { %v830_v56 = vpack.c.b16 %v814_v55, %v813_v54  ;;  %2720 = vmatpush.bf16.msra.mxu2 %v2681_v15  ;;  %2721 = vmatpush.bf16.msra.mxu3 %v2681_v15 }
 0x112   : > { %1579 = vmatpush.bf16.msrb.mxu0 %v2681_v15  ;;  %2719 = vmatpush.bf16.msrb.mxu1 %v2681_v15 }
 0x113   : > { %v859_v57 = vshrl.u32 %v830_v56, 16  ;;  %v862_v61 = vshll.u32 %v830_v56, 16  ;;  %v600_v56 = vadd.f32 %v3257_v4, %v3269_v17 }
 0x115   : > { %v3298_v60 = vrot.slane %v859_v57, 7  ;;  %v613_v57 = vadd.f32 %v3257_v4, %v3290_v52  ;;  %v659_v52 = vadd.f32 %v3271_v18, %v600_v56 }
 0x116   : > { %v614_v0 = vpop.f32.mrf.mxu0 }
 0x117   : > { %v3301_v1 = vpop.f32.mrf.mxu1  ;;  %v864_v5 = vor.u32 %v862_v61, %v3298_v60  ;;  %v615_v51 = vadd.f32 %v3257_v4, %v614_v0  ;;  %v772_v0 = vmul.f32 %v771_v45, %v769_v50  ;;  %v672_v9 = vadd.f32 %v3292_v53, %v613_v57 }
 0x118   : > { %v704_v53 = vmax.f32 %v659_v52, 0.0 }
 0x119   : > { %v3310_v8 = vsel %vm3279_vm2, 0, %v864_v5  ;;  %v674_v3 = vadd.f32 %v3301_v1, %v615_v51  ;;  %v775_v5 = vpack.c.bf16 %v773_v10, %v773_v10  ;;  %v709_v26 = vmax.f32 %v672_v9, 0.0 }
 0x11a   : > { %1109 = vrot.lane.b32.xlu2 %v3310_v8, %s3008_s20 }
 0x11b   : > { %v808_v18 = vunpack.c.l.b16 %v775_v5 }
 0x11e   : > { %v617_v19 = vpop.f32.mrf.mxu0 }
 0x11f   : > { %v676_v20 = vpop.f32.mrf.mxu1  ;;  %v618_v21 = vadd.f32 %v3257_v4, %v617_v19 }
 0x121   : > { %v677_v25 = vadd.f32 %v676_v20, %v618_v21  ;;  %v774_v20 = vpack.c.bf16 %v772_v0, %v772_v0  ;;  %v710_v21 = vmax.f32 %v674_v3, 0.0  ;;  %v2678_v0 = vld [vmem:[%s4062_s3 + $0x20] sm:$0xff] }
 0x122   : > { %1051 = vrot.lane.b32.xlu2 %v3323_v24, %s3008_s20 }
 0x123   : > { %v711_v29 = vmax.f32 %v677_v25, 0.0  ;;  %v730_v35 = vpack.c.bf16 %v710_v21, %v710_v21 }
 0x125   : > { %v731_v11 = vpack.c.bf16 %v711_v29, %v711_v29  ;;  %v816_v43 = vunpack.c.l.b16 %v730_v35 }
 0x126   : > { %v619_v27 = vpop.f32.mrf.mxu0 }
 0x127   : > { %v678_v28 = vpop.f32.mrf.mxu1  ;;  %v620_v30 = vadd.f32 %v3257_v4, %v619_v27  ;;  %v817_v39 = vunpack.c.l.b16 %v731_v11 }
 0x129   : > { %v679_v32 = vadd.f32 %v678_v28, %v620_v30 }
 0x12b   : > { %v712_v33 = vmax.f32 %v679_v32, 0.0 }
 0x12d   : > { %v732_v36 = vpack.c.bf16 %v712_v33, %v712_v33  ;;  %v807_v33 = vunpack.c.l.b16 %v774_v20 }
 0x12e   : > { %v622_v37 = vpop.f32.mrf.mxu0 }
 0x12f   : > { %v681_v38 = vpop.f32.mrf.mxu1  ;;  %v818_v12 = vunpack.c.l.b16 %v732_v36  ;;  %v623_v40 = vadd.f32 %v3257_v4, %v622_v37 }
 0x131   : > { %v832_v44 = vpack.c.b16 %v818_v12, %v817_v39  ;;  %v682_v49 = vadd.f32 %v681_v38, %v623_v40  ;;  %v2680_v38 = vld [vmem:[%s4062_s3 + $0x30] sm:$0xff]  ;;  %v827_v39 = vpack.c.b16 %v808_v18, %v807_v33  ;;  %v724_v12 = vpack.c.bf16 %v704_v53, %v704_v53 }
 0x132   : > { %v729_v40 = vpack.c.bf16 %v709_v26, %v709_v26  ;;  %2723 = vmatpush.bf16.msra.mxu2 %v2680_v38  ;;  %2724 = vmatpush.bf16.msra.mxu3 %v2680_v38  ;;  %v2676_v33 = vld [vmem:[%s4062_s3 + $0x10] sm:$0xff] }
 0x133   : > { %v873_v47 = vshrl.u32 %v832_v44, 16  ;;  %v876_v55 = vshll.u32 %v832_v44, 16  ;;  %v713_v62 = vmax.f32 %v682_v49, 0.0  ;;  %1580 = vmatpush.bf16.msrb.mxu0 %v2680_v38  ;;  %2722 = vmatpush.bf16.msrb.mxu1 %v2680_v38  ;;  %v810_v49 = vunpack.c.l.b16 %v724_v12 }
 0x134   : > { %v815_v50 = vunpack.c.l.b16 %v729_v40  ;;  %v841_v15 = vshll.u32 %v827_v39, 16  ;;  %v2675_v40 = vld [vmem:[%s4062_s3 + $0x8] sm:$0xff] }
 0x135   : > { %v875_v54 = vrot.slane %v873_v47, 7  ;;  %v733_v19 = vpack.c.bf16 %v713_v62, %v713_v62  ;;  %v2679_v47 = vld [vmem:[%s4062_s3 + $0x28] sm:$0xff] }
 0x136   : > { %v624_v58 = vpop.f32.mrf.mxu0  ;;  %2726 = vmatpush.bf16.msra.mxu2 %v2679_v47  ;;  %2727 = vmatpush.bf16.msra.mxu3 %v2679_v47 }
 0x137   : > { %v683_v59 = vpop.f32.mrf.mxu1  ;;  %v878_v61 = vor.u32 %v876_v55, %v875_v54  ;;  %v625_v63 = vadd.f32 %v3257_v4, %v624_v58  ;;  %v3339_v2 = vsel %vm3279_vm2, %v875_v54, 0  ;;  %v819_v31 = vunpack.c.l.b16 %v733_v19  ;;  %1581 = vmatpush.bf16.msrb.mxu0 %v2679_v47  ;;  %2725 = vmatpush.bf16.msrb.mxu1 %v2679_v47 }
 0x138   : > { %v1019_v14 = vshll.u32 %v3339_v2, 16  ;;  %v838_v54 = vshrl.u32 %v827_v39, 16 }
 0x139   : > { %v3344_v17 = vsel %vm3279_vm2, 0, %v878_v61  ;;  %v684_v6 = vadd.f32 %v683_v59, %v625_v63  ;;  %v809_v59 = vunpack.c.l.b16 %v723_v16  ;;  %v831_v61 = vpack.c.b16 %v816_v43, %v815_v50 }
 0x13a   : > { %v1014_v13 = vshll.u32 %v3344_v17, 16  ;;  %v1012_v22 = vshrl.u32 %v3344_v17, 16  ;;  %v1021_v30 = vrot.slane %v1019_v14, 1  ;;  %v840_v52 = vrot.slane %v838_v54, 7  ;;  %2729 = vmatpush.bf16.msra.mxu2 %v2678_v0  ;;  %v2677_v14 = vld [vmem:[%s4062_s3 + $0x18] sm:$0xff]  ;;  %2730 = vmatpush.bf16.msra.mxu3 %v2678_v0 }
 0x13b   : > { %v714_v1 = vmax.f32 %v684_v6, 0.0  ;;  %v828_v3 = vpack.c.b16 %v810_v49, %v809_v59  ;;  %v866_v19 = vshrl.u32 %v831_v61, 16  ;;  %1582 = vmatpush.bf16.msrb.mxu0 %v2678_v0  ;;  %2728 = vmatpush.bf16.msrb.mxu1 %v2678_v0  ;;  %v869_v35 = vshll.u32 %v831_v61, 16  ;;  %v2674_v61 = vld [vmem:[%s4062_s3] sm:$0xff] }
 0x13c   : > { %v1016_v23 = vrot.slane %v1014_v13, 1  ;;  %v843_v26 = vor.u32 %v841_v15, %v840_v52  ;;  %v3416_v54 = vsel %vm3279_vm2, %v840_v52, 0 }
 0x13d   : > { %v734_v25 = vpack.c.bf16 %v714_v1, %v714_v1  ;;  %v848_v39 = vshll.u32 %v828_v3, 16 }
 0x13e   : > { %v627_v27 = vpop.f32.mrf.mxu0  ;;  %v1017_v29 = vor.u32 %v1016_v23, %v1012_v22  ;;  %v845_v22 = vshrl.u32 %v828_v3, 16  ;;  %2732 = vmatpush.bf16.msra.mxu2 %v2677_v14  ;;  %2733 = vmatpush.bf16.msra.mxu3 %v2677_v14 }
 0x13f   : > { %v686_v28 = vpop.f32.mrf.mxu1  ;;  %v820_v32 = vunpack.c.l.b16 %v734_v25  ;;  %v628_v11 = vadd.f32 %v3257_v4, %v627_v27  ;;  %1583 = vmatpush.bf16.msrb.mxu0 %v2677_v14  ;;  %2731 = vmatpush.bf16.msrb.mxu1 %v2677_v14 }
 0x140   : > { %v3357_v36 = vsel %vm950_vm3, %v1017_v29, %v1021_v30  ;;  %v3386_v30 = vrot.slane %v866_v19, 7  ;;  %v847_v34 = vrot.slane %v845_v22, 7 }
 0x141   : > { %v833_v37 = vpack.c.b16 %v820_v32, %v819_v31  ;;  %1057 = vrot.lane.b32.xlu0 %v3357_v36, %s3008_s20  ;;  %v687_v42 = vadd.f32 %v686_v28, %v628_v11 }
 0x142   : > { %2735 = vmatpush.bf16.msra.mxu2 %v2676_v33  ;;  %2736 = vmatpush.bf16.msra.mxu3 %v2676_v33  ;;  %v871_v12 = vor.u32 %v869_v35, %v3386_v30  ;;  %v850_v47 = vor.u32 %v848_v39, %v847_v34 }
 0x143   : > { %v880_v41 = vshrl.u32 %v833_v37, 16  ;;  %v883_v45 = vshll.u32 %v833_v37, 16  ;;  %v715_v56 = vmax.f32 %v687_v42, 0.0  ;;  %v3398_v37 = vsel %vm3279_vm2, 0, %v843_v26  ;;  %1584 = vmatpush.bf16.msrb.mxu0 %v2676_v33  ;;  %2734 = vmatpush.bf16.msrb.mxu1 %v2676_v33 }
 0x144   : > { %v954_v43 = vshll.u32 %v3398_v37, 16  ;;  %v3433_v3 = vsel %vm3279_vm2, 0, %v850_v47 }
 0x145   : > { %v882_v44 = vrot.slane %v880_v41, 7  ;;  %v735_v9 = vpack.c.bf16 %v715_v56, %v715_v56  ;;  %v964_v39 = vshrl.u32 %v3433_v3, 16 }
 0x146   : > { %v629_v51 = vpop.f32.mrf.mxu0  ;;  %2738 = vmatpush.bf16.msra.mxu2 %v2675_v40  ;;  %2739 = vmatpush.bf16.msra.mxu3 %v2675_v40 }
 0x147   : > { %v688_v10 = vpop.f32.mrf.mxu1  ;;  %v885_v55 = vor.u32 %v883_v45, %v882_v44  ;;  %v630_v57 = vadd.f32 %v3257_v4, %v629_v51  ;;  %v3370_v58 = vsel %vm3279_vm2, %v882_v44, 0  ;;  %v821_v27 = vunpack.c.l.b16 %v735_v9  ;;  %1585 = vmatpush.bf16.msrb.mxu0 %v2675_v40  ;;  %2737 = vmatpush.bf16.msrb.mxu1 %v2675_v40 }
 0x148   : > { %v1031_v6 = vshll.u32 %v3370_v58, 16 }
 0x149   : > { %v3374_v62 = vsel %vm3279_vm2, 0, %v885_v55  ;;  %v689_v63 = vadd.f32 %v688_v10, %v630_v57  ;;  %v3412_v10 = vsel %vm3279_vm2, 0, %v871_v12  ;;  %v956_v57 = vrot.slane %v954_v43, 1 }
 0x14a   : > { %v1026_v5 = vshll.u32 %v3374_v62, 16  ;;  %v1024_v1 = vshrl.u32 %v3374_v62, 16  ;;  %v1033_v18 = vrot.slane %v1031_v6, 1  ;;  %v959_v6 = vshll.u32 %v3416_v54, 16  ;;  %2741 = vmatpush.bf16.msra.mxu2 %v2674_v61  ;;  %2742 = vmatpush.bf16.msra.mxu3 %v2674_v61 }
 0x14b   : > { %v716_v13 = vmax.f32 %v689_v63, 0.0  ;;  %v1002_v14 = vshll.u32 %v3412_v10, 16  ;;  %1586 = vmatpush.bf16.msrb.mxu0 %v2674_v61  ;;  %2740 = vmatpush.bf16.msrb.mxu1 %v2674_v61  ;;  %v990_v61 = vshll.u32 %v3310_v8, 16 }
 0x14c   : > { %v1028_v20 = vrot.slane %v1026_v5, 1  ;;  %v952_v5 = vshrl.u32 %v3398_v37, 16 }
 0x14d   : > { %v736_v21 = vpack.c.bf16 %v716_v13, %v716_v13 }
 0x14e   : > { %v1029_v23 = vor.u32 %v1028_v20, %v1024_v1  ;;  %v632_v25 = vpop.f32.mrf.mxu0  ;;  %v957_v19 = vor.u32 %v956_v57, %v952_v5  ;;  %v966_v20 = vshll.u32 %v3433_v3, 16  ;;  %v943_v5 = vsel %vm3279_vm2, %v3298_v60, 0 }
 0x14f   : > { %v691_v53 = vpop.f32.mrf.mxu1  ;;  %v822_v28 = vunpack.c.l.b16 %v736_v21  ;;  %v633_v29 = vadd.f32 %v3257_v4, %v632_v25  ;;  %v3443_v25 = vsel %vm3279_vm2, %v3386_v30, 0  ;;  %v988_v60 = vshrl.u32 %v3310_v8, 16 }
 0x150   : > { %v3389_v31 = vsel %vm950_vm3, %v1029_v23, %v1033_v18  ;;  %v961_v23 = vrot.slane %v959_v6, 1  ;;  %v968_v30 = vrot.slane %v966_v20, 1  ;;  %v1007_v33 = vshll.u32 %v3443_v25, 16 }
 0x151   : > { %v834_v32 = vpack.c.b16 %v822_v28, %v821_v27  ;;  %1059 = vrot.lane.b32.xlu0 %v3389_v31, %s3008_s20  ;;  %v692_v11 = vadd.f32 %v691_v53, %v633_v29  ;;  %v941_v53 = vsel %vm3279_vm2, %v847_v34, 0  ;;  %v1004_v27 = vrot.slane %v1002_v14, 1 }
 0x152   : > { %v1083_v28 = vrot.slane %v3433_v3, 1  ;;  %v962_v29 = vsel %vm950_vm3, %v957_v19, %v961_v23  ;;  %v1084_v34 = vrot.slane %v941_v53, 1  ;;  %v971_v12 = vshll.u32 %v941_v53, 16 }
 0x153   : > { %v887_v38 = vshrl.u32 %v834_v32, 16  ;;  %v890_v42 = vshll.u32 %v834_v32, 16  ;;  %v717_v16 = vmax.f32 %v692_v11, 0.0  ;;  %v1000_v11 = vshrl.u32 %v3412_v10, 16 }
 0x154   : > { %v969_v43 = vor.u32 %v968_v30, %v964_v39  ;;  %v1096_v6 = vrot.slane %v3339_v2, 1  ;;  %v992_v14 = vrot.slane %v990_v61, 1  ;;  %v995_v2 = vshll.u32 %v943_v5, 16 }
 0x155   : > { %v889_v41 = vrot.slane %v887_v38, 7  ;;  %v737_v56 = vpack.c.bf16 %v717_v16, %v717_v16  ;;  %v1087_v39 = vrot.slane %v3306_v7, 1  ;;  %v1093_v7 = vrot.slane %v3443_v25, 1 }
 0x156   : > { %v634_v44 = vpop.f32.mrf.mxu0  ;;  %v997_v23 = vrot.slane %v995_v2, 1  ;;  %v2708_v2 = vld [vmem:[%s4062_s3 + $0x110] sm:$0xff] }
 0x157   : > { %v693_v45 = vpop.f32.mrf.mxu1  ;;  %v892_v49 = vor.u32 %v890_v42, %v889_v41  ;;  %v635_v50 = vadd.f32 %v3257_v4, %v634_v44  ;;  %v3408_v51 = vsel %vm3279_vm2, %v889_v41, 0  ;;  %v823_v15 = vunpack.c.l.b16 %v737_v56 }
 0x158   : > { %v1043_v0 = vshll.u32 %v3408_v51, 16  ;;  %v1005_v41 = vor.u32 %v1004_v27, %v1000_v11  ;;  %v1085_v42 = vsel %vm1079_vm4, %v1083_v28, %v1084_v34  ;;  %v1099_v11 = vrot.slane %v3370_v58, 1 }
 0x159   : > { %1111 = vrot.lane.b32.xlu0 %v3412_v10, %s3008_s20  ;;  %v3422_v55 = vsel %vm3279_vm2, 0, %v892_v49  ;;  %v694_v59 = vadd.f32 %v693_v45, %v635_v50  ;;  %v1009_v45 = vrot.slane %v1007_v33, 1  ;;  %v973_v49 = vrot.slane %v971_v12, 1 }
 0x15a   : > { %1117 = vrot.lane.b32.xlu2 %v3422_v55, %s3008_s20  ;;  %v1038_v63 = vshll.u32 %v3422_v55, 16  ;;  %v1036_v9 = vshrl.u32 %v3422_v55, 16  ;;  %v1045_v22 = vrot.slane %v1043_v0, 1  ;;  %v1095_v0 = vrot.slane %v3344_v17, 1 }
 0x15b   : > { %v718_v52 = vmax.f32 %v694_v59, 0.0  ;;  %v3465_v50 = vsel %vm950_vm3, %v1005_v41, %v1009_v45  ;;  %v3476_v57 = vsel %vm950_vm3, %v969_v43, %v973_v49  ;;  %v1101_v41 = vrot.slane %v3422_v55, 1  ;;  %v2689_v43 = vld [vmem:[%s4062_s3 + $0x78] sm:$0xff]  ;;  %v2688_v49 = vld [vmem:[%s4062_s3 + $0x70] sm:$0xff] }
 0x15c   : > { %v1040_v13 = vrot.slane %v1038_v63, 1  ;;  %v1102_v45 = vrot.slane %v3408_v51, 1  ;;  %1628 = vmatpush.bf16.msrb.mxu3 %v2689_v43 }
 0x15d   : > { %v738_v1 = vpack.c.bf16 %v718_v52, %v718_v52 }
 0x15e   : > { %v1041_v21 = vor.u32 %v1040_v13, %v1036_v9 }
 0x15f   : > { %v824_v18 = vunpack.c.l.b16 %v738_v1  ;;  %v696_v25 = vpop.f32.mrf.mxu1 }
 0x160   : > { %v3448_v26 = vsel %vm950_vm3, %v1041_v21, %v1045_v22  ;;  %v993_v21 = vor.u32 %v992_v14, %v988_v60  ;;  %v1089_v22 = vrot.slane %v3310_v8, 1  ;;  %1629 = vmatpush.bf16.msrb.mxu3 %v2688_v49  ;;  %v2687_v14 = vld [vmem:[%s4062_s3 + $0x68] sm:$0xff] }
 0x161   : > { %1061 = vrot.lane.b32.xlu1 %v3448_v26, %s3008_s20  ;;  %1115 = vrot.lane.b32.xlu0 %v3374_v62, %s3008_s20  ;;  %v835_v32 = vpack.c.b16 %v824_v18, %v823_v15  ;;  %v3494_v15 = vsel %vm1079_vm4, %v1095_v0, %v1096_v6  ;;  %v1090_v18 = vrot.slane %v943_v5, 1 }
 0x162   : > { %1047 = vrot.lane.b32.xlu2 %v962_v29, %s3008_s20  ;;  %v3507_v27 = vsel %vm950_vm3, %v993_v21, %v997_v23  ;;  %v2686_v23 = vld [vmem:[%s4062_s3 + $0x60] sm:$0xff] }
 0x163   : > { %v894_v35 = vshrl.u32 %v835_v32, 16  ;;  %v897_v38 = vshll.u32 %v835_v32, 16  ;;  %v3510_v28 = vsel %vm1079_vm4, %v1089_v22, %v1090_v18  ;;  %v1098_v32 = vrot.slane %v3374_v62, 1  ;;  %v2707_v18 = vld [vmem:[%s4062_s3 + $0x108] sm:$0xff] }
 0x164   : > { %v1108_v40 = vpop.permute.xlu2 %1107  ;;  %1630 = vmatpush.bf16.msrb.mxu3 %v2687_v14 }
 0x165   : > { %v896_v16 = vrot.slane %v894_v35, 7  ;;  %v3462_v44 = vsel %vm1174_vm5, %v1085_v42, %v1108_v40  ;;  %v3526_v33 = vsel %vm1079_vm4, %v1098_v32, %v1099_v11  ;;  %v2706_v32 = vld [vmem:[%s4062_s3 + $0x100] sm:$0xff] }
 0x167   : > { %v899_v47 = vor.u32 %v897_v38, %v896_v16  ;;  %v948_v63 = vsel %vm3279_vm2, %v896_v16, 0  ;;  %v1086_v38 = vrot.slane %v3285_v48, 1 }
 0x168   : > { %v1129_v13 = vshll.u32 %v948_v63, 16  ;;  %v1135_v35 = vrot.slane %v948_v63, 1  ;;  %v778_v63 = vstv %s777_s17  ;;  %1631 = vmatpush.bf16.msrb.mxu3 %v2686_v23  ;;  %v2695_v23 = vld [vmem:[%s4062_s3 + $0xa8] sm:$0xff] }
 0x169   : > { %v3469_v56 = vsel %vm3279_vm2, 0, %v899_v47  ;;  %1055 = vrot.lane.b32.xlu0 %v3465_v50, %s3008_s20  ;;  %1105 = vrot.lane.b32.xlu1 %v3433_v3, %s3008_s20  ;;  %v3539_v12 = vsel %vm1079_vm4, %v1086_v38, %v1087_v39  ;;  %v782_v6 = vunpack.c.l.bf16 %v778_v63  ;;  %v2685_v38 = vld [vmem:[%s4062_s3 + $0x58] sm:$0xff] }
 0x16a   : > { %1049 = vrot.lane.b32.xlu2 %v3476_v57, %s3008_s20  ;;  %v1124_v59 = vshll.u32 %v3469_v56, 16  ;;  %v1122_v52 = vshrl.u32 %v3469_v56, 16  ;;  %v1131_v1 = vrot.slane %v1129_v13, 1  ;;  %v1134_v34 = vrot.slane %v3469_v56, 1  ;;  %v2709_v13 = vld [vmem:[%s4062_s3 + $0x118] sm:$0xff] }
 0x16b   : > { %1779 = vmatpush.bf16.msra.mxu0 %v2709_v13 }
 0x16c   : > { %v1126_v9 = vrot.slane %v1124_v59, 1  ;;  %v3536_v58 = vsel %vm1079_vm4, %v1134_v34, %v1135_v35  ;;  %v3562_v59 = vsel %vm1079_vm4, %v1101_v41, %v1102_v45  ;;  %1632 = vmatpush.bf16.msrb.mxu3 %v2685_v38 }
 0x16e   : > { %v1127_v19 = vor.u32 %v1126_v9, %v1122_v52  ;;  %v698_v9 = vpop.f32.mrf.mxu1 }
 0x16f   : > { %1780 = vmatpush.bf16.msra.mxu0 %v2708_v2 }
 0x170   : > { %v3504_v53 = vsel %vm950_vm3, %v1127_v19, %v1131_v1 }
 0x171   : > { %1113 = vrot.lane.b32.xlu1 %v3344_v17, %s3008_s20  ;;  %1137 = vrot.lane.b32.xlu0 %v1085_v42, %s3008_s20  ;;  %v637_v42 = vpop.f32.mrf.mxu0 }
 0x172   : > { %1145 = vrot.lane.b32.xlu2 %v3494_v15, %s3008_s20  ;;  %v638_v16 = vadd.f32 %v3257_v4, %v637_v42 }
 0x173   : > { %1781 = vmatpush.bf16.msra.mxu0 %v2707_v18  ;;  %v2694_v18 = vld [vmem:[%s4062_s3 + $0xa0] sm:$0xff] }
 0x174   : > { %v3499_v20 = vpop.permute.xlu2 %1109  ;;  %v697_v47 = vadd.f32 %v696_v25, %v638_v16 }
 0x176   : > { %v719_v61 = vmax.f32 %v697_v47, 0.0  ;;  %v2683_v47 = vld [vmem:[%s4062_s3 + $0x48] sm:$0xff] }
 0x177   : > { %1782 = vmatpush.bf16.msra.mxu0 %v2706_v32  ;;  %v1080_v32 = vrot.slane %v3398_v37, 1 }
 0x178   : > { %v739_v0 = vpack.c.bf16 %v719_v61, %v719_v61 }
 0x179   : > { %1053 = vrot.lane.b32.xlu1 %v3507_v27, %s3008_s20  ;;  %1141 = vrot.lane.b32.xlu0 %v3510_v28, %s3008_s20  ;;  %v639_v5 = vpop.f32.mrf.mxu0 }
 0x17a   : > { %1165 = vrot.lane.b32.xlu2 %v3504_v53, %s3008_s20  ;;  %v780_v51 = vunpack.c.l.bf16 %v739_v0  ;;  %v640_v52 = vadd.f32 %v3257_v4, %v639_v5 }
 0x17c   : > { %v1052_v29 = vpop.permute.xlu2 %1051  ;;  %v699_v60 = vadd.f32 %v698_v9, %v640_v52  ;;  %v783_v19 = vmul.f32 %v782_v6, %v780_v51 }
 0x17d   : > { %v3521_v30 = vsel %vm1174_vm5, %v3285_v48, %v1052_v29  ;;  %v1092_v48 = vrot.slane %v3412_v10, 1 }
 0x17e   : > { %1597 = vmatmul.bf16.vlgmr.msra.gmra.mxu2 %v3521_v30  ;;  %v720_v1 = vmax.f32 %v699_v60, 0.0  ;;  %v785_v4 = vpack.c.bf16 %v783_v19, %v783_v19 }
 0x17f   : > { %v3548_v40 = vsel %vm1079_vm4, %v1092_v48, %v1093_v7  ;;  %v2684_v48 = vld [vmem:[%s4062_s3 + $0x50] sm:$0xff] }
 0x180   : > { %v740_v21 = vpack.c.bf16 %v720_v1, %v720_v1  ;;  %v825_v11 = vunpack.c.l.b16 %v785_v4  ;;  %1633 = vmatpush.bf16.msrb.mxu3 %v2684_v48  ;;  %v2705_v1 = vld [vmem:[%s4062_s3 + $0xf8] sm:$0xff] }
 0x181   : > { %1119 = vrot.lane.b32.xlu1 %v3469_v56, %s3008_s20  ;;  %1147 = vrot.lane.b32.xlu0 %v3526_v33, %s3008_s20 }
 0x182   : > { %v781_v22 = vunpack.c.l.bf16 %v740_v21  ;;  %v2697_v21 = vld [vmem:[%s4062_s3 + $0xb8] sm:$0xff] }
 0x183   : > { %1677 = vmatpush.bf16.msrb.mxu2 %v2697_v21 }
 0x184   : > { %v784_v29 = vmul.f32 %v782_v6, %v781_v22  ;;  %1634 = vmatpush.bf16.msrb.mxu3 %v2683_v47  ;;  %v2704_v22 = vld [vmem:[%s4062_s3 + $0xf0] sm:$0xff] }
 0x186   : > { %v786_v34 = vpack.c.bf16 %v784_v29, %v784_v29 }
 0x188   : > { %v826_v35 = vunpack.c.l.b16 %v786_v34  ;;  %1635 = vmatpush.bf16.msrb.mxu3 %v2682_v46  ;;  %v2692_v34 = vld [vmem:[%s4062_s3 + $0x90] sm:$0xff] }
 0x189   : > { %1139 = vrot.lane.b32.xlu1 %v3539_v12, %s3008_s20  ;;  %1151 = vrot.lane.b32.xlu0 %v3536_v58, %s3008_s20 }
 0x18a   : > { %v836_v39 = vpack.c.b16 %v826_v35, %v825_v11  ;;  %v1081_v11 = vrot.slane %v3416_v54, 1  ;;  %v2690_v54 = vld [vmem:[%s4062_s3 + $0x80] sm:$0xff] }
 0x18c   : > { %v901_v7 = vshrl.u32 %v836_v39, 16  ;;  %v904_v41 = vshll.u32 %v836_v39, 16  ;;  %v1082_v38 = vsel %vm1079_vm4, %v1080_v32, %v1081_v11  ;;  %v2714_v11 = vld [vmem:[%s4064_s5 + $0x24] sm:$0xf] }
 0x18e   : > { %v903_v42 = vrot.slane %v901_v7, 7  ;;  %v2703_v7 = vld [vmem:[%s4062_s3 + $0xe8] sm:$0xff] }
 0x190   : > { %v906_v43 = vor.u32 %v904_v41, %v903_v42  ;;  %v3608_v63 = vsel %vm3279_vm2, %v903_v42, 0 }
 0x191   : > { %1143 = vrot.lane.b32.xlu1 %v3548_v40, %s3008_s20  ;;  %v1161_v5 = vshll.u32 %v3608_v63, 16 }
 0x192   : > { %v3603_v49 = vsel %vm3279_vm2, 0, %v906_v43  ;;  %v2702_v43 = vld [vmem:[%s4062_s3 + $0xe0] sm:$0xff] }
 0x193   : > { %v1156_v61 = vshll.u32 %v3603_v49, 16  ;;  %v1163_v6 = vrot.slane %v1161_v5, 1 }
 0x195   : > { %v1158_v0 = vrot.slane %v1156_v61, 1 }
 0x199   : > { %1149 = vrot.lane.b32.xlu1 %v3562_v59, %s3008_s20 }
 0x1b3   : > { %v1058_v16 = vpop.permute.xlu0 %1057 }
 0x1b4   : > { %v3591_v45 = vpop.permute.xlu2 %1117  ;;  %v3595_v25 = vsel %vm1174_vm5, %v3344_v17, %v1058_v16  ;;  %v1154_v17 = vshrl.u32 %v3603_v49, 16 }
 0x1b5   : > { %1612 = vmatmul.bf16.vlgmr.msra.gmra.mxu3 %v3595_v25 }
 0x1b6   : > { %v1159_v51 = vor.u32 %v1158_v0, %v1154_v17  ;;  %1726 = vmatpush.bf16.msra.mxu3 %v2705_v1 }
 0x1b8   : > { %v1164_v13 = vsel %vm950_vm3, %v1159_v51, %v1163_v6 }
 0x1b9   : > { %1167 = vrot.lane.b32.xlu1 %v1164_v13, %s3008_s20  ;;  %v1172_v13 = vrot.slane %v3608_v63, 1  ;;  %s2629_s20 = sshll.u32 %s2992_s8, 6 }
 0x1ba   : > { %1727 = vmatpush.bf16.msra.mxu3 %v2704_v22  ;;  %s2165_s15 = sadd.s32 %s2718_s21, %s2629_s20 }
 0x1bb   : > { %s2630_s17 = sshll.u32 %s2165_s15, 3 }
 0x1bc   : > { %v1048_v52 = vpop.permute.xlu2 %1047 }
 0x1bd   : > { %v1176_v9 = vsel %vm1174_vm5, %v3398_v37, %v1048_v52  ;;  %v2691_v37 = vld [vmem:[%s4062_s3 + $0x88] sm:$0xff] }
 0x1be   : > { %1587 = vmatmul.bf16.vlgmr.msrb.gmra.mxu0 %v1176_v9  ;;  %1728 = vmatpush.bf16.msra.mxu3 %v2703_v7  ;;  %v1171_v9 = vrot.slane %v3603_v49, 1 }
 0x1c2   : > { %1729 = vmatpush.bf16.msra.mxu3 %v2702_v43 }
 0x1c3   : > { %v1060_v14 = vpop.permute.xlu0 %1059 }
 0x1c4   : > { %v1050_v60 = vpop.permute.xlu2 %1049  ;;  %v3621_v2 = vsel %vm1174_vm5, %v3374_v62, %v1060_v14  ;;  %v2696_v62 = vld [vmem:[%s4062_s3 + $0xb0] sm:$0xff]  ;;  %v1173_v14 = vsel %vm1079_vm4, %v1171_v9, %v1172_v13 }
 0x1c5   : > { %1617 = vmatmul.bf16.gmra.mxu3 %v3621_v2  ;;  %v1179_v19 = vsel %vm1174_vm5, %v3433_v3, %v1050_v60  ;;  %1678 = vmatpush.bf16.msrb.mxu2 %v2696_v62  ;;  %v1225_v60 = vsel %vm1174_vm5, %v3526_v33, %v3591_v45  ;;  %v2606_v45 = vld [vmem:[%s4064_s5 + $0x38] sm:$0xf0] }
 0x1c6   : > { %1592 = vmatmul.bf16.vlgmr.msrb.gmra.mxu1 %v1179_v19 }
 0x1c9   : > { %1679 = vmatpush.bf16.msrb.mxu2 %v2695_v23 }
 0x1cb   : > { %v1112_v48 = vpop.permute.xlu0 %1111 }
 0x1cc   : > { %v1213_v5 = vsel %vm1174_vm5, %v3510_v28, %v1112_v48  ;;  %v1146_v19 = vpop.permute.xlu2 %1145 }
 0x1cd   : > { %1680 = vmatpush.bf16.msrb.mxu2 %v2694_v18  ;;  %v1249_v1 = vsel %vm1174_vm5, %v3357_v36, %v1146_v19  ;;  %v2604_v19 = vld [vmem:[%s4064_s5 + $0x30] sm:$0xf] }
 0x1ce   : > { %2570 = vmatmul.msk.bf16.vlgmr.msra.gmra.mxu0 %vm1174_vm5, %v3539_v12 }
 0x1d3   : > { %v1062_v4 = vpop.permute.xlu1 %1061  ;;  %v1116_v16 = vpop.permute.xlu0 %1115 }
 0x1d4   : > { %v3639_v3 = vsel %vm1174_vm5, %v3422_v55, %v1062_v4  ;;  %v2693_v55 = vld [vmem:[%s4062_s3 + $0x98] sm:$0xff]  ;;  %v1166_v9 = vpop.permute.xlu2 %1165 }
 0x1d5   : > { %1622 = vmatmul.bf16.gmra.mxu3 %v3639_v3  ;;  %1681 = vmatpush.bf16.msrb.mxu2 %v2693_v55 }
 0x1d9   : > { %1682 = vmatpush.bf16.msrb.mxu2 %v2692_v34 }
 0x1db   : > { %v1106_v29 = vpop.permute.xlu1 %1105  ;;  %v1056_v47 = vpop.permute.xlu0 %1055 }
 0x1dc   : > { %v1201_v39 = vsel %vm1174_vm5, %v1082_v38, %v1106_v29  ;;  %v3685_v61 = vsel %vm1174_vm5, %v3412_v10, %v1056_v47  ;;  %v2712_v47 = vld [vmem:[%s4064_s5 + $0x14] sm:$0xf] }
 0x1dd   : > { %1683 = vmatpush.bf16.msrb.mxu2 %v2691_v37 }
 0x1de   : > { %2571 = vmatmul.msk.bf16.gmra.mxu0 %vm1174_vm5, %v3510_v28  ;;  %v2699_v28 = vld [vmem:[%s4062_s3 + $0xc8] sm:$0xff] }
 0x1e1   : > { %1684 = vmatpush.bf16.msrb.mxu2 %v2690_v54 }
 0x1e3   : > { %v1114_v35 = vpop.permute.xlu1 %1113  ;;  %v1138_v17 = vpop.permute.xlu0 %1137 }
 0x1e4   : > { %v1233_v10 = vsel %vm1174_vm5, %v3476_v57, %v1138_v17  ;;  %v1217_v57 = vsel %vm1174_vm5, %v3548_v40, %v1114_v35 }
 0x1e5   : > { %1636 = vmatmul.bf16.vlgmr.msrb.gmra.mxu3 %v1201_v39  ;;  %v3779_v39 = vld [vmem:[%s4063_s4] ss:$0 sm:$0xff] }
 0x1eb   : > { %v1054_v41 = vpop.permute.xlu1 %1053  ;;  %v1142_v6 = vpop.permute.xlu0 %1141 }
 0x1ec   : > { %v3674_v42 = vsel %vm1174_vm5, %v3310_v8, %v1054_v41  ;;  %v1209_v8 = vsel %vm1174_vm5, %v3539_v12, %v3499_v20  ;;  %v2700_v20 = vld [vmem:[%s4062_s3 + $0xd0] sm:$0xff]  ;;  %v1241_v52 = vsel %vm1174_vm5, %v3507_v27, %v1142_v6 }
 0x1ed   : > { %1602 = vmatmul.bf16.gmra.mxu2 %v3674_v42 }
 0x1ee   : > { %2572 = vmatmul.msk.bf16.gmra.mxu0 %vm1174_vm5, %v3548_v40  ;;  %v2698_v40 = vld [vmem:[%s4062_s3 + $0xc0] sm:$0xff] }
 0x1f3   : > { %v1120_v0 = vpop.permute.xlu1 %1119  ;;  %v1148_v4 = vpop.permute.xlu0 %1147 }
 0x1f4   : > { %v1253_v36 = vsel %vm1174_vm5, %v3389_v31, %v1148_v4 }
 0x1f5   : > { %1641 = vmatmul.bf16.gmra.mxu3 %v3462_v44  ;;  %v2701_v44 = vld [vmem:[%s4062_s3 + $0xd8] sm:$0xff] }
 0x1f6   : > { %1730 = vmatpush.bf16.msra.mxu3 %v2701_v44 }
 0x1fa   : > { %1731 = vmatpush.bf16.msra.mxu3 %v2700_v20 }
 0x1fb   : > { %v1140_v12 = vpop.permute.xlu1 %1139  ;;  %v1152_v31 = vpop.permute.xlu0 %1151 }
 0x1fc   : > { %v1237_v51 = vsel %vm1174_vm5, %v3323_v24, %v1140_v12  ;;  %v1221_v24 = vsel %vm1174_vm5, %v3494_v15, %v1116_v16 }
 0x1fd   : > { %1607 = vmatmul.bf16.gmra.mxu2 %v3685_v61 }
 0x1fe   : > { %2573 = vmatmul.msk.bf16.gmra.mxu0 %vm1174_vm5, %v3494_v15  ;;  %1732 = vmatpush.bf16.msra.mxu3 %v2699_v28  ;;  %v2710_v28 = vld [vmem:[%s4064_s5 + $0x4] sm:$0xf] }
 0x201   : > { %v1598_v35 = vpop.f32.mrf.mxu2 }
 0x202   : > { %1733 = vmatpush.bf16.msra.mxu3 %v2698_v40  ;;  %v1599_v48 = vadd.f32 %v3779_v39, %v1598_v35 }
 0x203   : > { %v1144_v27 = vpop.permute.xlu1 %1143 }
 0x205   : > { %1646 = vmatmul.bf16.gmra.mxu3 %v1209_v8 }
 0x209   : > { %v3783_v7 = vpop.f32.mrf.mxu2 }
 0x20b   : > { %v1150_v18 = vpop.permute.xlu1 %1149 }
 0x20c   : > { %v1257_v29 = vsel %vm1174_vm5, %v3448_v26, %v1150_v18  ;;  %v1261_v26 = vsel %vm1174_vm5, %v3504_v53, %v1152_v31  ;;  %v2588_v18 = vld [vmem:[%s4064_s5 + $0x10] sm:$0xf] }
 0x20d   : > { %1685 = vmatmul.bf16.vlgmr.msrb.gmra.mxu2 %v1233_v10 }
 0x20e   : > { %2574 = vmatmul.msk.bf16.gmra.mxu0 %vm1174_vm5, %v3526_v33  ;;  %v2716_v33 = vld [vmem:[%s4064_s5 + $0x34] sm:$0xf] }
 0x20f   : > { %v2609_v22 = vor.u32 %v2716_v33, %v2606_v45 }
 0x211   : > { %1979 = vmatpush.bf16.msra.mxu2 %v2609_v22 }
 0x215   : > { %1651 = vmatmul.bf16.gmra.mxu3 %v1213_v5 }
 0x21d   : > { %1690 = vmatmul.bf16.gmra.mxu2 %v1237_v51 }
 0x21e   : > { %2575 = vmatmul.msk.bf16.gmra.mxu0 %vm1174_vm5, %v3562_v59 }
 0x225   : > { %1656 = vmatmul.bf16.gmra.mxu3 %v1217_v57 }
 0x22b   : > { %v1168_v31 = vpop.permute.xlu1 %1167 }
 0x22d   : > { %1695 = vmatmul.bf16.gmra.mxu2 %v1241_v52 }
 0x22e   : > { %2576 = vmatmul.msk.bf16.gmra.mxu0 %vm1174_vm5, %v3536_v58  ;;  %v1245_v58 = vsel %vm1174_vm5, %v3465_v50, %v1144_v27  ;;  %v1229_v50 = vsel %vm1174_vm5, %v3562_v59, %v1120_v0  ;;  %v1264_v27 = vsel %vm1174_vm5, %v3469_v56, %v1166_v9  ;;  %v2596_v56 = vld [vmem:[%s4064_s5 + $0x20] sm:$0xf] }
 0x235   : > { %1661 = vmatmul.bf16.gmra.mxu3 %v1221_v24 }
 0x238   : > { %v3725_v46 = vpop.f32.mrf.mxu3 }
 0x239   : > { %v1614_v12 = vadd.f32 %v3779_v39, %v3725_v46 }
 0x23b   : > { %v1588_v6 = vpop.f32.mrf.mxu0 }
 0x23d   : > { %1700 = vmatmul.bf16.gmra.mxu2 %v1245_v58 }
 0x23e   : > { %2577 = vmatmul.msk.bf16.gmra.mxu0 %vm1174_vm5, %v1173_v14 }
 0x240   : > { %v3731_v15 = vpop.f32.mrf.mxu3 }
 0x243   : > { %v1590_v46 = vpop.f32.mrf.mxu0 }
 0x245   : > { %1666 = vmatmul.bf16.gmra.mxu3 %v1225_v60 }
 0x248   : > { %v3736_v63 = vpop.f32.mrf.mxu3 }
 0x249   : > { %v1619_v58 = vadd.f32 %v3779_v39, %v3736_v63  ;;  %v2715_v63 = vld [vmem:[%s4064_s5 + $0x24] sm:$0xf0] }
 0x24a   : > { %v2597_v4 = vor.u32 %v2715_v63, %v2596_v56 }
 0x24b   : > { %v1784_v33 = vpop.f32.mrf.mxu0 }
 0x24d   : > { %1705 = vmatmul.bf16.gmra.mxu2 %v1249_v1 }
 0x250   : > { %v3740_v21 = vpop.f32.mrf.mxu3 }
 0x251   : > { %v1621_v45 = vadd.f32 %v3779_v39, %v3740_v21  ;;  %v2580_v21 = vld [vmem:[%s4064_s5] sm:$0xf] }
 0x255   : > { %1671 = vmatmul.bf16.gmra.mxu3 %v1229_v50 }
 0x258   : > { %v3744_v62 = vpop.f32.mrf.mxu3 }
 0x25d   : > { %1710 = vmatmul.bf16.gmra.mxu2 %v1253_v36 }
 0x260   : > { %v3754_v23 = vpop.f32.mrf.mxu3 }
 0x265   : > { %1734 = vmatmul.bf16.vlgmr.msra.gmra.mxu3 %v3521_v30  ;;  %v2598_v30 = vld [vmem:[%s4064_s5 + $0x28] sm:$0xf0] }
 0x266   : > { %v2601_v34 = vor.u32 %v2714_v11, %v2598_v30 }
 0x268   : > { %v3757_v59 = vpop.f32.mrf.mxu3  ;;  %1980 = vmatpush.bf16.msra.mxu2 %v2601_v34  ;;  %v1267_v34 = vsel %vm1174_vm5, %v3603_v49, %v1168_v31  ;;  %v1626_v49 = vadd.f32 %v3779_v39, %v3754_v23 }
 0x26d   : > { %1715 = vmatmul.bf16.gmra.mxu2 %v1257_v29  ;;  %v2713_v29 = vld [vmem:[%s4064_s5 + $0x14] sm:$0xf0] }
 0x26e   : > { %v2589_v30 = vor.u32 %v2713_v29, %v2588_v18 }
 0x270   : > { %v3761_v55 = vpop.f32.mrf.mxu3  ;;  %v1603_v53 = vpop.f32.mrf.mxu2 }
 0x275   : > { %1739 = vmatmul.bf16.gmra.mxu3 %v3674_v42  ;;  %v1604_v42 = vadd.f32 %v3779_v39, %v1603_v53 }
 0x278   : > { %v3764_v32 = vpop.f32.mrf.mxu3  ;;  %v3799_v8 = vpop.f32.mrf.mxu2 }
 0x27d   : > { %1720 = vmatmul.bf16.gmra.mxu2 %v1261_v26  ;;  %v2711_v26 = vld [vmem:[%s4064_s5 + $0x4] sm:$0xf0] }
 0x27e   : > { %v2581_v35 = vor.u32 %v2711_v26, %v2580_v21 }
 0x280   : > { %v3774_v38 = vpop.f32.mrf.mxu3 }
 0x285   : > { %1744 = vmatmul.bf16.gmra.mxu3 %v3685_v61  ;;  %v2590_v61 = vld [vmem:[%s4064_s5 + $0x18] sm:$0xf0] }
 0x286   : > { %v2593_v44 = vor.u32 %v2712_v47, %v2590_v61 }
 0x288   : > { %v1647_v37 = vpop.f32.mrf.mxu3  ;;  %1981 = vmatpush.bf16.msra.mxu2 %v2593_v44 }
 0x289   : > { %v3785_v54 = vadd.f32 %v1647_v37, %v1599_v48  ;;  %v1624_v48 = vadd.f32 %v3779_v39, %v3744_v62  ;;  %v1786_v37 = vpop.f32.mrf.mxu0  ;;  %v1591_v62 = vadd.f32 %v3779_v39, %v1590_v46 }
 0x290   : > { %v3787_v41 = vpop.f32.mrf.mxu3 }
 0x291   : > { %v1789_v44 = vpop.f32.mrf.mxu0 }
 0x295   : > { %1749 = vmatmul.bf16.gmra.mxu3 %v3595_v25  ;;  %v1608_v25 = vpop.f32.mrf.mxu2 }
 0x296   : > { %v1609_v10 = vadd.f32 %v3779_v39, %v1608_v25 }
 0x298   : > { %v1652_v16 = vpop.f32.mrf.mxu3 }
 0x299   : > { %v3791_v43 = vadd.f32 %v1652_v16, %v1604_v42 }
 0x29d   : > { %v3820_v24 = vpop.f32.mrf.mxu2 }
 0x2a0   : > { %v3801_v17 = vpop.f32.mrf.mxu3 }
 0x2a5   : > { %1754 = vmatmul.bf16.gmra.mxu3 %v3621_v2  ;;  %v2582_v2 = vld [vmem:[%s4064_s5 + $0x8] sm:$0xf0]  ;;  %v1686_v14 = vpop.f32.mrf.mxu2 }
 0x2a6   : > { %v2585_v52 = vor.u32 %v2710_v28, %v2582_v2  ;;  %v1791_v28 = vpop.f32.mrf.mxu0  ;;  %v1593_v2 = vpop.f32.mrf.mxu1 }
 0x2a8   : > { %v1657_v0 = vpop.f32.mrf.mxu3  ;;  %1982 = vmatpush.bf16.msra.mxu2 %v2585_v52  ;;  %v1640_v52 = vadd.f32 %v3761_v55, %v1591_v62 }
 0x2a9   : > { %v3805_v5 = vadd.f32 %v1657_v0, %v1609_v10  ;;  %v1589_v10 = vadd.f32 %v3779_v39, %v1588_v6 }
 0x2ad   : > { %v1688_v22 = vpop.f32.mrf.mxu2 }
 0x2ae   : > { %v1689_v23 = vadd.f32 %v1688_v22, %v1640_v52  ;;  %v1794_v6 = vpop.f32.mrf.mxu0 }
 0x2b0   : > { %v3807_v20 = vpop.f32.mrf.mxu3 }
 0x2b5   : > { %1759 = vmatmul.bf16.gmra.mxu3 %v3639_v3  ;;  %v1616_v3 = vadd.f32 %v3779_v39, %v3731_v15  ;;  %v2717_v15 = vld [vmem:[%s4064_s5 + $0x34] sm:$0xf0]  ;;  %v1691_v16 = vpop.f32.mrf.mxu2 }
 0x2b6   : > { %v2605_v50 = vor.u32 %v2717_v15, %v2604_v19 }
 0x2b8   : > { %v1662_v51 = vpop.f32.mrf.mxu3  ;;  %1930 = vmatpush.bf16.msra.mxu1 %v2605_v50  ;;  %v1594_v50 = vadd.f32 %v3779_v39, %v1593_v2 }
 0x2b9   : > { %v3812_v57 = vadd.f32 %v1662_v51, %v1614_v12  ;;  %v1638_v12 = vadd.f32 %v3757_v59, %v1589_v10  ;;  %v1595_v59 = vpop.f32.mrf.mxu1 }
 0x2ba   : > { %v1643_v63 = vadd.f32 %v3764_v32, %v1594_v50  ;;  %v1596_v55 = vadd.f32 %v3779_v39, %v1595_v59 }
 0x2bb   : > { %v1687_v51 = vadd.f32 %v1686_v14, %v1638_v12 }
 0x2bc   : > { %1931 = vmatpush.bf16.msra.mxu1 %v2597_v4  ;;  %v1692_v4 = vadd.f32 %v1691_v16, %v1643_v63 }
 0x2bd   : > { %v1693_v25 = vpop.f32.mrf.mxu2 }
 0x2c0   : > { %v1664_v40 = vpop.f32.mrf.mxu3  ;;  %1932 = vmatpush.bf16.msra.mxu1 %v2589_v30 }
 0x2c1   : > { %v3824_v13 = vadd.f32 %v1664_v40, %v1616_v3 }
 0x2c4   : > { %1933 = vmatpush.bf16.msra.mxu1 %v2581_v35 }
 0x2c5   : > { %1764 = vmatmul.bf16.gmra.mxu3 %v1264_v27  ;;  %v1696_v40 = vpop.f32.mrf.mxu2 }
 0x2c8   : > { %v1667_v60 = vpop.f32.mrf.mxu3 }
 0x2c9   : > { %v3836_v1 = vadd.f32 %v1667_v60, %v1619_v58 }
 0x2cd   : > { %v1698_v46 = vpop.f32.mrf.mxu2 }
 0x2d0   : > { %v1669_v36 = vpop.f32.mrf.mxu3 }
 0x2d1   : > { %v3852_v11 = vadd.f32 %v1669_v36, %v1621_v45  ;;  %v1796_v36 = vpop.f32.mrf.mxu0 }
 0x2d5   : > { %1769 = vmatmul.bf16.gmra.mxu3 %v1267_v34  ;;  %v1701_v30 = vpop.f32.mrf.mxu2 }
 0x2d8   : > { %v1672_v53 = vpop.f32.mrf.mxu3 }
 0x2d9   : > { %v3864_v42 = vadd.f32 %v1672_v53, %v1624_v48  ;;  %v1799_v48 = vpop.f32.mrf.mxu0 }
 0x2dd   : > { %v1703_v53 = vpop.f32.mrf.mxu2 }
 0x2e0   : > { %v1674_v47 = vpop.f32.mrf.mxu3 }
 0x2e1   : > { %v3868_v61 = vadd.f32 %v1674_v47, %v1626_v49  ;;  %v1801_v12 = vpop.f32.mrf.mxu0 }
 0x2e8   : > { %v1735_v0 = vpop.f32.mrf.mxu3 }
 0x2e9   : > { %v1736_v3 = vadd.f32 %v1735_v0, %v1687_v51 }
 0x2eb   : > { %v1785_v27 = vadd.f32 %v1784_v33, %v1736_v3  ;;  %v1645_v33 = vadd.f32 %v3774_v38, %v1596_v55  ;;  %v1601_v38 = vadd.f32 %v3779_v39, %v3783_v7  ;;  %v1606_v7 = vadd.f32 %v3779_v39, %v3799_v8 }
 0x2ec   : > { %v1611_v8 = vadd.f32 %v3779_v39, %v3820_v24 }
 0x2ed   : > { %v1824_v19 = vmax.f32 %v1785_v27, 0.0  ;;  %v1694_v22 = vadd.f32 %v1693_v25, %v1645_v33  ;;  %v1650_v16 = vadd.f32 %v3787_v41, %v1601_v38  ;;  %v1655_v41 = vadd.f32 %v3801_v17, %v1606_v7 }
 0x2ef   : > { %v1699_v47 = vadd.f32 %v1698_v46, %v1650_v16  ;;  %v1660_v46 = vadd.f32 %v3807_v20, %v1611_v8  ;;  %v331_v8 = vld [vmem:[%s3220_s19 + $0x8] sm:$0xff] }
 0x2f0   : > { %v1737_v9 = vpop.f32.mrf.mxu3 }
 0x2f1   : > { %v1738_v58 = vadd.f32 %v1737_v9, %v1689_v23  ;;  %v1704_v23 = vadd.f32 %v1703_v53, %v1655_v41 }
 0x2f3   : > { %v1787_v60 = vadd.f32 %v1786_v37, %v1738_v58  ;;  %v1697_v37 = vadd.f32 %v1696_v40, %v3785_v54  ;;  %v1702_v54 = vadd.f32 %v1701_v30, %v3791_v43  ;;  %v1804_v40 = vpop.f32.mrf.mxu0 }
 0x2f5   : > { %v1825_v15 = vmax.f32 %v1787_v60, 0.0 }
 0x2f7   : > { %v1840_v56 = vpack.c.bf16 %v1825_v15, %v1824_v19 }
 0x2f8   : > { %v1740_v14 = vpop.f32.mrf.mxu3 }
 0x2f9   : > { %2610 = vmatmul.msk.bf16.vlgmr.msra.gmra.mxu1 %vm1174_vm5, %v1840_v56  ;;  %2618 = vmatmul.msk.bf16.vlgmr.msra.gmra.mxu2 %vm1174_vm5, %v1840_v56  ;;  %v1741_v45 = vadd.f32 %v1740_v14, %v1692_v4 }
 0x2fb   : > { %v1790_v29 = vadd.f32 %v1789_v44, %v1741_v45  ;;  %v1806_v59 = vpop.f32.mrf.mxu0 }
 0x2fd   : > { %v1826_v21 = vmax.f32 %v1790_v29, 0.0 }
 0x300   : > { %v1742_v18 = vpop.f32.mrf.mxu3 }
 0x301   : > { %v1743_v31 = vadd.f32 %v1742_v18, %v1694_v22 }
 0x303   : > { %v1792_v34 = vadd.f32 %v1791_v28, %v1743_v31  ;;  %v1706_v28 = vpop.f32.mrf.mxu2  ;;  %v1809_v45 = vpop.f32.mrf.mxu0 }
 0x304   : > { %v1707_v17 = vadd.f32 %v1706_v28, %v3805_v5 }
 0x305   : > { %v1827_v26 = vmax.f32 %v1792_v34, 0.0 }
 0x307   : > { %v1841_v32 = vpack.c.bf16 %v1827_v26, %v1826_v21 }
 0x308   : > { %v1745_v35 = vpop.f32.mrf.mxu3 }
 0x309   : > { %2611 = vmatmul.msk.bf16.gmra.mxu1 %vm1174_vm5, %v1841_v32  ;;  %2619 = vmatmul.msk.bf16.gmra.mxu2 %vm1174_vm5, %v1841_v32  ;;  %v1746_v49 = vadd.f32 %v1745_v35, %v1697_v37 }
 0x30b   : > { %v1795_v25 = vadd.f32 %v1794_v6, %v1746_v49  ;;  %v1708_v9 = vpop.f32.mrf.mxu2  ;;  %v1811_v5 = vpop.f32.mrf.mxu0 }
 0x30c   : > { %v1709_v63 = vadd.f32 %v1708_v9, %v1660_v46 }
 0x30d   : > { %v1828_v62 = vmax.f32 %v1795_v25, 0.0 }
 0x310   : > { %v1747_v44 = vpop.f32.mrf.mxu3 }
 0x311   : > { %v1748_v10 = vadd.f32 %v1747_v44, %v1699_v47 }
 0x313   : > { %v1797_v0 = vadd.f32 %v1796_v36, %v1748_v10  ;;  %v1711_v43 = vpop.f32.mrf.mxu2  ;;  %v1814_v37 = vpop.f32.mrf.mxu0 }
 0x314   : > { %v1712_v39 = vadd.f32 %v1711_v43, %v3812_v57 }
 0x315   : > { %v1829_v51 = vmax.f32 %v1797_v0, 0.0 }
 0x317   : > { %v1842_v2 = vpack.c.bf16 %v1829_v51, %v1828_v62 }
 0x318   : > { %v1750_v52 = vpop.f32.mrf.mxu3 }
 0x319   : > { %2612 = vmatmul.msk.bf16.gmra.mxu1 %vm1174_vm5, %v1842_v2  ;;  %2620 = vmatmul.msk.bf16.gmra.mxu2 %vm1174_vm5, %v1842_v2  ;;  %v1751_v3 = vadd.f32 %v1750_v52, %v1702_v54 }
 0x31b   : > { %v1800_v58 = vadd.f32 %v1799_v48, %v1751_v3  ;;  %v1713_v36 = vpop.f32.mrf.mxu2 }
 0x31c   : > { %v1714_v34 = vadd.f32 %v1713_v36, %v3824_v13  ;;  %v1816_v13 = vpop.f32.mrf.mxu0 }
 0x31d   : > { %v1830_v15 = vmax.f32 %v1800_v58, 0.0 }
 0x320   : > { %v1752_v27 = vpop.f32.mrf.mxu3 }
 0x321   : > { %v1753_v60 = vadd.f32 %v1752_v27, %v1704_v23 }
 0x323   : > { %v1802_v19 = vadd.f32 %v1801_v12, %v1753_v60  ;;  %v1716_v24 = vpop.f32.mrf.mxu2 }
 0x324   : > { %v1717_v57 = vadd.f32 %v1716_v24, %v3836_v1  ;;  %v1819_v52 = vpop.f32.mrf.mxu0 }
 0x325   : > { %v1831_v6 = vmax.f32 %v1802_v19, 0.0 }
 0x327   : > { %v1843_v50 = vpack.c.bf16 %v1831_v6, %v1830_v15  ;;  %v330_v15 = vld [vmem:[%s3220_s19] sm:$0xff] }
 0x328   : > { %v1755_v56 = vpop.f32.mrf.mxu3  ;;  %v2024_v6 = vunpack.c.l.bf16 %v330_v15  ;;  %v2025_v46 = vunpack.c.h.bf16 %v330_v15 }
 0x329   : > { %2613 = vmatmul.msk.bf16.gmra.mxu1 %vm1174_vm5, %v1843_v50  ;;  %2621 = vmatmul.msk.bf16.gmra.mxu2 %vm1174_vm5, %v1843_v50  ;;  %v1756_v14 = vadd.f32 %v1755_v56, %v1707_v17 }
 0x32b   : > { %v1805_v4 = vadd.f32 %v1804_v40, %v1756_v14  ;;  %v1718_v16 = vpop.f32.mrf.mxu2 }
 0x32c   : > { %v1719_v44 = vadd.f32 %v1718_v16, %v3852_v11  ;;  %v1821_v9 = vpop.f32.mrf.mxu0 }
 0x32d   : > { %v1832_v18 = vmax.f32 %v1805_v4, 0.0 }
 0x330   : > { %v1757_v55 = vpop.f32.mrf.mxu3 }
 0x331   : > { %v1758_v33 = vadd.f32 %v1757_v55, %v1709_v63  ;;  %v2026_v55 = vunpack.c.l.bf16 %v331_v8 }
 0x333   : > { %v1807_v22 = vadd.f32 %v1806_v59, %v1758_v33  ;;  %v1721_v12 = vpop.f32.mrf.mxu2 }
 0x334   : > { %v1722_v1 = vadd.f32 %v1721_v12, %v3864_v42  ;;  %v1856_v42 = vld [vmem:[%s4065_s6] sm:$0x3] }
 0x335   : > { %v1833_v29 = vmax.f32 %v1807_v22, 0.0  ;;  %v3922_v43 = vperm.slane %v1856_v42, 1 }
 0x337   : > { %v1844_v31 = vpack.c.bf16 %v1833_v29, %v1832_v18  ;;  %v332_v18 = vld [vmem:[%s3220_s19 + $0x10] sm:$0xff] }
 0x338   : > { %v1760_v30 = vpop.f32.mrf.mxu3 }
 0x339   : > { %2614 = vmatmul.msk.bf16.gmra.mxu1 %vm1174_vm5, %v1844_v31  ;;  %2622 = vmatmul.msk.bf16.gmra.mxu2 %vm1174_vm5, %v1844_v31  ;;  %v1761_v20 = vadd.f32 %v1760_v30, %v1712_v39  ;;  %v2027_v31 = vunpack.c.h.bf16 %v331_v8 }
 0x33b   : > { %v1810_v26 = vadd.f32 %v1809_v45, %v1761_v20  ;;  %v1723_v54 = vpop.f32.mrf.mxu2 }
 0x33c   : > { %v1724_v41 = vadd.f32 %v1723_v54, %v3868_v61  ;;  %v3916_v61 = vperm.slane %v1856_v42, 0 }
 0x33d   : > { %v1834_v48 = vmax.f32 %v1810_v26, 0.0 }
 0x340   : > { %v1762_v21 = vpop.f32.mrf.mxu3 }
 0x341   : > { %v1763_v32 = vadd.f32 %v1762_v21, %v1714_v34 }
 0x343   : > { %v1812_v35 = vadd.f32 %v1811_v5, %v1763_v32  ;;  %v2028_v5 = vunpack.c.l.bf16 %v332_v18  ;;  %v333_v32 = vld [vmem:[%s3220_s19 + $0x18] sm:$0xff] }
 0x345   : > { %v1835_v38 = vmax.f32 %v1812_v35, 0.0 }
 0x347   : > { %v1845_v53 = vpack.c.bf16 %v1835_v38, %v1834_v48  ;;  %v2029_v48 = vunpack.c.h.bf16 %v332_v18 }
 0x348   : > { %v1765_v49 = vpop.f32.mrf.mxu3 }
 0x349   : > { %2615 = vmatmul.msk.bf16.gmra.mxu1 %vm1174_vm5, %v1845_v53  ;;  %2623 = vmatmul.msk.bf16.gmra.mxu2 %vm1174_vm5, %v1845_v53  ;;  %v1766_v47 = vadd.f32 %v1765_v49, %v1717_v57  ;;  %v2030_v53 = vunpack.c.l.bf16 %v333_v32 }
 0x34b   : > { %v1815_v10 = vadd.f32 %v1814_v37, %v1766_v47 }
 0x34d   : > { %v1836_v51 = vmax.f32 %v1815_v10, 0.0  ;;  %v2031_v10 = vunpack.c.h.bf16 %v333_v32 }
 0x350   : > { %v1767_v25 = vpop.f32.mrf.mxu3 }
 0x351   : > { %v1768_v0 = vadd.f32 %v1767_v25, %v1719_v44 }
 0x353   : > { %v1817_v62 = vadd.f32 %v1816_v13, %v1768_v0  ;;  %v334_v13 = vld [vmem:[%s3220_s19 + $0x20] sm:$0xff] }
 0x355   : > { %v1837_v28 = vmax.f32 %v1817_v62, 0.0  ;;  %v2032_v62 = vunpack.c.l.bf16 %v334_v13 }
 0x357   : > { %v1846_v2 = vpack.c.bf16 %v1837_v28, %v1836_v51 }
 0x358   : > { %v1770_v7 = vpop.f32.mrf.mxu3 }
 0x359   : > { %2616 = vmatmul.msk.bf16.gmra.mxu1 %vm1174_vm5, %v1846_v2  ;;  %2624 = vmatmul.msk.bf16.gmra.mxu2 %vm1174_vm5, %v1846_v2  ;;  %v1771_v11 = vadd.f32 %v1770_v7, %v1722_v1  ;;  %v335_v1 = vld [vmem:[%s3220_s19 + $0x28] sm:$0xff] }
 0x35a   : > { %v2035_v15 = vunpack.c.h.bf16 %v335_v1 }
 0x35b   : > { %v1820_v40 = vadd.f32 %v1819_v52, %v1771_v11  ;;  %v2033_v11 = vunpack.c.h.bf16 %v334_v13 }
 0x35d   : > { %v1838_v58 = vmax.f32 %v1820_v40, 0.0  ;;  %v2034_v40 = vunpack.c.l.bf16 %v335_v1 }
 0x360   : > { %v1772_v3 = vpop.f32.mrf.mxu3 }
 0x361   : > { %v1773_v23 = vadd.f32 %v1772_v3, %v1724_v41 }
 0x363   : > { %v1822_v27 = vadd.f32 %v1821_v9, %v1773_v23 }
 0x365   : > { %v1839_v60 = vmax.f32 %v1822_v27, 0.0 }
 0x367   : > { %v1847_v19 = vpack.c.bf16 %v1839_v60, %v1838_v58 }
 0x369   : > { %2617 = vmatmul.msk.bf16.gmra.mxu1 %vm1174_vm5, %v1847_v19  ;;  %2625 = vmatmul.msk.bf16.gmra.mxu2 %vm1174_vm5, %v1847_v19  ;;  %v336_v19 = vld [vmem:[%s3220_s19 + $0x30] sm:$0xff] }
 0x376   : > { %v1935_v50 = vpop.f32.mrf.mxu1 }
 0x377   : > { %v1936_v59 = vadd.f32 %v1935_v50, %v3916_v61 }
 0x379   : > { %v2056_v56 = vadd.f32 %v2024_v6, %v1936_v59  ;;  %v2036_v59 = vunpack.c.l.bf16 %v336_v19 }
 0x37b   : > { %v2088_v17 = vmax.f32 %v2056_v56, 0.0 }
 0x37c   : > { %v1984_v14 = vpop.f32.mrf.mxu2 }
 0x37d   : > { %2120 = vst [vmem:[%s3925_s13] sm:$0xff] %v2088_v17  ;;  %v1985_v63 = vadd.f32 %v1984_v14, %v3922_v43 }
 0x37e   : > { %v1937_v4 = vpop.f32.mrf.mxu1 }
 0x37f   : > { %v2057_v33 = vadd.f32 %v2025_v46, %v1985_v63  ;;  %v1938_v45 = vadd.f32 %v1937_v4, %v3916_v61  ;;  %v337_v63 = vld [vmem:[%s3220_s19 + $0x38] sm:$0xff]  ;;  %v2037_v4 = vunpack.c.h.bf16 %v336_v19 }
 0x381   : > { %v2089_v22 = vmax.f32 %v2057_v33, 0.0  ;;  %v2058_v36 = vadd.f32 %v2026_v55, %v1938_v45 }
 0x383   : > { %2121 = vst [vmem:[%s3925_s13 + $0x8] sm:$0xff] %v2089_v22  ;;  %v2090_v29 = vmax.f32 %v2058_v36, 0.0  ;;  %v2038_v22 = vunpack.c.l.bf16 %v337_v63 }
 0x384   : > { %v1986_v30 = vpop.f32.mrf.mxu2 }
 0x385   : > { %2122 = vst [vmem:[%s3925_s13 + $0x10] sm:$0xff] %v2090_v29  ;;  %v1987_v39 = vadd.f32 %v1986_v30, %v3922_v43 }
 0x386   : > { %v1940_v20 = vpop.f32.mrf.mxu1 }
 0x387   : > { %v2059_v24 = vadd.f32 %v2027_v31, %v1987_v39  ;;  %v1941_v34 = vadd.f32 %v1940_v20, %v3916_v61  ;;  %v338_v39 = vld [vmem:[%s3220_s19 + $0x40] sm:$0xff]  ;;  %v2039_v20 = vunpack.c.h.bf16 %v337_v63 }
 0x389   : > { %v2091_v21 = vmax.f32 %v2059_v24, 0.0  ;;  %v2060_v26 = vadd.f32 %v2028_v5, %v1941_v34 }
 0x38b   : > { %2123 = vst [vmem:[%s3925_s13 + $0x18] sm:$0xff] %v2091_v21  ;;  %v2092_v35 = vmax.f32 %v2060_v26, 0.0  ;;  %v2040_v21 = vunpack.c.l.bf16 %v338_v39 }
 0x38c   : > { %v1989_v38 = vpop.f32.mrf.mxu2 }
 0x38d   : > { %2124 = vst [vmem:[%s3925_s13 + $0x20] sm:$0xff] %v2092_v35  ;;  %v1990_v37 = vadd.f32 %v1989_v38, %v3922_v43 }
 0x38e   : > { %v1942_v16 = vpop.f32.mrf.mxu1 }
 0x38f   : > { %v2061_v49 = vadd.f32 %v2029_v48, %v1990_v37  ;;  %v1943_v57 = vadd.f32 %v1942_v16, %v3916_v61  ;;  %v339_v37 = vld [vmem:[%s3220_s19 + $0x48] sm:$0xff]  ;;  %v2041_v16 = vunpack.c.h.bf16 %v338_v39 }
 0x391   : > { %v2093_v47 = vmax.f32 %v2061_v49, 0.0  ;;  %v2062_v44 = vadd.f32 %v2030_v53, %v1943_v57 }
 0x393   : > { %2125 = vst [vmem:[%s3925_s13 + $0x28] sm:$0xff] %v2093_v47  ;;  %v2094_v25 = vmax.f32 %v2062_v44, 0.0  ;;  %v2042_v47 = vunpack.c.l.bf16 %v339_v37 }
 0x394   : > { %v1991_v0 = vpop.f32.mrf.mxu2 }
 0x395   : > { %2126 = vst [vmem:[%s3925_s13 + $0x30] sm:$0xff] %v2094_v25  ;;  %v1992_v12 = vadd.f32 %v1991_v0, %v3922_v43 }
 0x396   : > { %v1945_v51 = vpop.f32.mrf.mxu1 }
 0x397   : > { %v2063_v28 = vadd.f32 %v2031_v10, %v1992_v12  ;;  %v1946_v2 = vadd.f32 %v1945_v51, %v3916_v61  ;;  %v340_v12 = vld [vmem:[%s3220_s19 + $0x50] sm:$0xff]  ;;  %v2043_v51 = vunpack.c.h.bf16 %v339_v37 }
 0x399   : > { %v2095_v52 = vmax.f32 %v2063_v28, 0.0  ;;  %v2064_v7 = vadd.f32 %v2032_v62, %v1946_v2 }
 0x39b   : > { %2127 = vst [vmem:[%s3925_s13 + $0x38] sm:$0xff] %v2095_v52  ;;  %v2096_v54 = vmax.f32 %v2064_v7, 0.0  ;;  %v2044_v52 = vunpack.c.l.bf16 %v340_v12 }
 0x39c   : > { %v1994_v41 = vpop.f32.mrf.mxu2 }
 0x39d   : > { %2128 = vst [vmem:[%s3925_s13 + $0x40] sm:$0xff] %v2096_v54  ;;  %v1995_v3 = vadd.f32 %v1994_v41, %v3922_v43 }
 0x39e   : > { %v1947_v23 = vpop.f32.mrf.mxu1 }
 0x39f   : > { %v2065_v9 = vadd.f32 %v2033_v11, %v1995_v3  ;;  %v1948_v27 = vadd.f32 %v1947_v23, %v3916_v61  ;;  %v341_v3 = vld [vmem:[%s3220_s19 + $0x58] sm:$0xff]  ;;  %v2045_v23 = vunpack.c.h.bf16 %v340_v12 }
 0x3a1   : > { %v2097_v58 = vmax.f32 %v2065_v9, 0.0  ;;  %v2066_v60 = vadd.f32 %v2034_v40, %v1948_v27 }
 0x3a3   : > { %2129 = vst [vmem:[%s3925_s13 + $0x48] sm:$0xff] %v2097_v58  ;;  %v2098_v42 = vmax.f32 %v2066_v60, 0.0  ;;  %v2046_v58 = vunpack.c.l.bf16 %v341_v3 }
 0x3a4   : > { %v1996_v6 = vpop.f32.mrf.mxu2 }
 0x3a5   : > { %2130 = vst [vmem:[%s3925_s13 + $0x50] sm:$0xff] %v2098_v42  ;;  %v1997_v50 = vadd.f32 %v1996_v6, %v3922_v43 }
 0x3a6   : > { %v1950_v56 = vpop.f32.mrf.mxu1 }
 0x3a7   : > { %v2067_v8 = vadd.f32 %v2035_v15, %v1997_v50  ;;  %v1951_v17 = vadd.f32 %v1950_v56, %v3916_v61  ;;  %v342_v50 = vld [vmem:[%s3220_s19 + $0x60] sm:$0xff]  ;;  %v2047_v56 = vunpack.c.h.bf16 %v341_v3 }
 0x3a9   : > { %v2099_v46 = vmax.f32 %v2067_v8, 0.0  ;;  %v2068_v14 = vadd.f32 %v2036_v59, %v1951_v17 }
 0x3ab   : > { %2131 = vst [vmem:[%s3925_s13 + $0x58] sm:$0xff] %v2099_v46  ;;  %v2100_v55 = vmax.f32 %v2068_v14, 0.0  ;;  %v2048_v46 = vunpack.c.l.bf16 %v342_v50 }
 0x3ac   : > { %v1999_v33 = vpop.f32.mrf.mxu2 }
 0x3ad   : > { %2132 = vst [vmem:[%s3925_s13 + $0x60] sm:$0xff] %v2100_v55  ;;  %v2000_v45 = vadd.f32 %v1999_v33, %v3922_v43 }
 0x3ae   : > { %v1952_v36 = vpop.f32.mrf.mxu1 }
 0x3af   : > { %v2069_v18 = vadd.f32 %v2037_v4, %v2000_v45  ;;  %v1953_v29 = vadd.f32 %v1952_v36, %v3916_v61  ;;  %v343_v45 = vld [vmem:[%s3220_s19 + $0x68] sm:$0xff]  ;;  %v2049_v36 = vunpack.c.h.bf16 %v342_v50 }
 0x3b1   : > { %v2101_v31 = vmax.f32 %v2069_v18, 0.0  ;;  %v2070_v30 = vadd.f32 %v2038_v22, %v1953_v29 }
 0x3b3   : > { %2133 = vst [vmem:[%s3925_s13 + $0x68] sm:$0xff] %v2101_v31  ;;  %v2102_v5 = vmax.f32 %v2070_v30, 0.0  ;;  %v2050_v31 = vunpack.c.l.bf16 %v343_v45 }
 0x3b4   : > { %v2001_v24 = vpop.f32.mrf.mxu2 }
 0x3b5   : > { %2134 = vst [vmem:[%s3925_s13 + $0x70] sm:$0xff] %v2102_v5  ;;  %v2002_v34 = vadd.f32 %v2001_v24, %v3922_v43 }
 0x3b6   : > { %v1955_v26 = vpop.f32.mrf.mxu1 }
 0x3b7   : > { %v2071_v32 = vadd.f32 %v2039_v20, %v2002_v34  ;;  %v1956_v35 = vadd.f32 %v1955_v26, %v3916_v61  ;;  %v344_v34 = vld [vmem:[%s3220_s19 + $0x70] sm:$0xff]  ;;  %v2051_v26 = vunpack.c.h.bf16 %v343_v45 }
 0x3b9   : > { %v2103_v48 = vmax.f32 %v2071_v32, 0.0  ;;  %v2072_v38 = vadd.f32 %v2040_v21, %v1956_v35 }
 0x3bb   : > { %2135 = vst [vmem:[%s3925_s13 + $0x78] sm:$0xff] %v2103_v48  ;;  %v2104_v53 = vmax.f32 %v2072_v38, 0.0  ;;  %v2052_v48 = vunpack.c.l.bf16 %v344_v34 }
 0x3bc   : > { %v2004_v49 = vpop.f32.mrf.mxu2 }
 0x3bd   : > { %2136 = vst [vmem:[%s3925_s13 + $0x80] sm:$0xff] %v2104_v53  ;;  %v2005_v57 = vadd.f32 %v2004_v49, %v3922_v43 }
 0x3be   : > { %v1957_v44 = vpop.f32.mrf.mxu1 }
 0x3bf   : > { %v2073_v13 = vadd.f32 %v2041_v16, %v2005_v57  ;;  %v1958_v25 = vadd.f32 %v1957_v44, %v3916_v61  ;;  %v345_v57 = vld [vmem:[%s3220_s19 + $0x78] sm:$0xff]  ;;  %v2053_v44 = vunpack.c.h.bf16 %v344_v34  ;;  %s4088_s19 = sld [smem:[#allocation15_spill]] }
 0x3c1   : > { %v2105_v10 = vmax.f32 %v2073_v13, 0.0  ;;  %v2074_v0 = vadd.f32 %v2042_v47, %v1958_v25 }
 0x3c3   : > { %2137 = vst [vmem:[%s3925_s13 + $0x88] sm:$0xff] %v2105_v10  ;;  %v2106_v62 = vmax.f32 %v2074_v0, 0.0  ;;  %v2054_v10 = vunpack.c.l.bf16 %v345_v57 }
 0x3c4   : > { %v2006_v28 = vpop.f32.mrf.mxu2 }
 0x3c5   : > { %2138 = vst [vmem:[%s3925_s13 + $0x90] sm:$0xff] %v2106_v62  ;;  %v2007_v2 = vadd.f32 %v2006_v28, %v3922_v43  ;;  %s2167_s23 = scalar_lea.hbm %s4088_s19, %s2630_s17  ;;  %s2902_s20 = scalar_lea.hbm %s4088_s19, 1024 }
 0x3c6   : > { %v1960_v7 = vpop.f32.mrf.mxu1  ;;  %s2170_s10 = sshll.u32 %s2167_s23, 4  ;;  %s2171_s10 = int_to_ptr.hbm [resolvable:$true] %s2170_s10 }
 0x3c7   : > { %v2075_v1 = vadd.f32 %v2043_v51, %v2007_v2  ;;  %v1961_v54 = vadd.f32 %v1960_v7, %v3916_v61  ;;  %s2896_s12 = sshra.s32 %s2171_s10, 4  ;;  %s2897_s12 = int_to_ptr.hbm [resolvable:$true] %s2896_s12 }
 0x3c8   : > { %s2898_s18 = scalar_lea.hbm %s2897_s12, 256  ;;  %p2903_p5 = scmp.lt.s32.totalorder %s2897_s12, %s4088_s19 }
 0x3c9   : > { %v2107_v11 = vmax.f32 %v2075_v1, 0.0  ;;  %v2076_v41 = vadd.f32 %v2044_v52, %v1961_v54  ;;  %v2055_v52 = vunpack.c.h.bf16 %v345_v57  ;;  %p2899_p0 = scmp.ne.s32.totalorder %s2897_s12, %s2898_s18  ;;  %p2904_p6 = scmp.lt.s32.totalorder %s2902_s20, %s2898_s18 }
 0x3cb   : > { %2139 = vst [vmem:[%s3925_s13 + $0x98] sm:$0xff] %v2107_v11  ;;  %v2108_v40 = vmax.f32 %v2076_v41, 0.0  ;;  %p2900_p1 = pnand %p2899_p0, %p3133_p12  ;;  %p2905_p8 = por %p2904_p6, %p2903_p5 }
 0x3cc   : > { %v2009_v9 = vpop.f32.mrf.mxu2 }
 0x3cd   : > { %2140 = vst [vmem:[%s3925_s13 + $0xa0] sm:$0xff] %v2108_v40  ;;  %v2010_v27 = vadd.f32 %v2009_v9, %v3922_v43  ;;  %p2901_p4 = pneg %p2900_p1 }
 0x3ce   : > { %v1962_v60 = vpop.f32.mrf.mxu1 }
 0x3cf   : > { %v2077_v19 = vadd.f32 %v2045_v23, %v2010_v27  ;;  %v1963_v42 = vadd.f32 %v1962_v60, %v3916_v61  ;;  %p2906_p3 = pnand %p2905_p8, %p2901_p4 }
 0x3d1   : > { %v2109_v15 = vmax.f32 %v2077_v19, 0.0  ;;  %v2078_v6 = vadd.f32 %v2046_v58, %v1963_v42 }
 0x3d3   : > { %2141 = vst [vmem:[%s3925_s13 + $0xa8] sm:$0xff] %v2109_v15  ;;  %v2110_v59 = vmax.f32 %v2078_v6, 0.0 }
 0x3d4   : > { %v2011_v8 = vpop.f32.mrf.mxu2 }
 0x3d5   : > { %2142 = vst [vmem:[%s3925_s13 + $0xb0] sm:$0xff] %v2110_v59  ;;  %v2012_v17 = vadd.f32 %v2011_v8, %v3922_v43 }
 0x3d6   : > { %v1965_v14 = vpop.f32.mrf.mxu1 }
 0x3d7   : > { %v2079_v63 = vadd.f32 %v2047_v56, %v2012_v17  ;;  %v1966_v55 = vadd.f32 %v1965_v14, %v3916_v61 }
 0x3d9   : > { %v2111_v4 = vmax.f32 %v2079_v63, 0.0  ;;  %v2080_v33 = vadd.f32 %v2048_v46, %v1966_v55 }
 0x3db   : > { %2143 = vst [vmem:[%s3925_s13 + $0xb8] sm:$0xff] %v2111_v4  ;;  %v2112_v22 = vmax.f32 %v2080_v33, 0.0 }
 0x3dc   : > { %v2014_v18 = vpop.f32.mrf.mxu2 }
 0x3dd   : > { %2144 = vst [vmem:[%s3925_s13 + $0xc0] sm:$0xff] %v2112_v22  ;;  %v2015_v29 = vadd.f32 %v2014_v18, %v3922_v43 }
 0x3de   : > { %v1967_v30 = vpop.f32.mrf.mxu1 }
 0x3df   : > { %v2081_v39 = vadd.f32 %v2049_v36, %v2015_v29  ;;  %v1968_v5 = vadd.f32 %v1967_v30, %v3916_v61 }
 0x3e1   : > { %v2113_v20 = vmax.f32 %v2081_v39, 0.0  ;;  %v2082_v24 = vadd.f32 %v2050_v31, %v1968_v5 }
 0x3e3   : > { %2145 = vst [vmem:[%s3925_s13 + $0xc8] sm:$0xff] %v2113_v20  ;;  %v2114_v21 = vmax.f32 %v2082_v24, 0.0 }
 0x3e4   : > { %v2016_v32 = vpop.f32.mrf.mxu2 }
 0x3e5   : > { %2146 = vst [vmem:[%s3925_s13 + $0xd0] sm:$0xff] %v2114_v21  ;;  %v2017_v35 = vadd.f32 %v2016_v32, %v3922_v43 }
 0x3e6   : > { %v1970_v38 = vpop.f32.mrf.mxu1 }
 0x3e7   : > { %v2083_v37 = vadd.f32 %v2051_v26, %v2017_v35  ;;  %v1971_v53 = vadd.f32 %v1970_v38, %v3916_v61 }
 0x3e9   : > { %v2115_v16 = vmax.f32 %v2083_v37, 0.0  ;;  %v2084_v49 = vadd.f32 %v2052_v48, %v1971_v53 }
 0x3eb   : > { %2147 = vst [vmem:[%s3925_s13 + $0xd8] sm:$0xff] %v2115_v16  ;;  %v2116_v47 = vmax.f32 %v2084_v49, 0.0 }
 0x3ec   : > { %v2019_v13 = vpop.f32.mrf.mxu2 }
 0x3ed   : > { %2148 = vst [vmem:[%s3925_s13 + $0xe0] sm:$0xff] %v2116_v47  ;;  %v2020_v25 = vadd.f32 %v2019_v13, %v3922_v43 }
 0x3ee   : > { %v1972_v0 = vpop.f32.mrf.mxu1 }
 0x3ef   : > { %v2085_v12 = vadd.f32 %v2053_v44, %v2020_v25  ;;  %v1973_v62 = vadd.f32 %v1972_v0, %v3916_v61 }
 0x3f1   : > { %v2117_v51 = vmax.f32 %v2085_v12, 0.0  ;;  %v2086_v28 = vadd.f32 %v2054_v10, %v1973_v62 }
 0x3f3   : > { %2149 = vst [vmem:[%s3925_s13 + $0xe8] sm:$0xff] %v2117_v51  ;;  %v2118_v2 = vmax.f32 %v2086_v28, 0.0 }
 0x3f4   : > { %v2021_v7 = vpop.f32.mrf.mxu2 }
 0x3f5   : > { %2150 = vst [vmem:[%s3925_s13 + $0xf0] sm:$0xff] %v2118_v2  ;;  %v2022_v1 = vadd.f32 %v2021_v7, %v3922_v43 }
 0x3f7   : > { %v2087_v61 = vadd.f32 %v2055_v52, %v2022_v1 }
 0x3f9   : > { %v2119_v54 = vmax.f32 %v2087_v61, 0.0 }
 0x3fb   : > { %2151 = vst [vmem:[%s3925_s13 + $0xf8] sm:$0xff] %v2119_v54 }
 0x3fc   : > { %2909 = shalt.err (!%p2906_p3)
}
 0x3fd   : > { %s3009_s22 = smov 256   ;;  %s3010_s13 = smov 16  }
 0x3fe   : > { %2745 = dma.vmem_to_hbm [thread:$0]  (%p3133_p12), %s2169_s14, 4096, %s2171_s10, %s2153_s27, %s3009_s22, %s3009_s22, %s3010_s13  }
 0x3ff PF: > { %p2756_p7 = scmp.ge.s32.totalorder %s3004_s11, 2  ;;  %s2185_s30 = sand.u32 1, %s2964_s24  }
 0x400   : > { %s2186_s8 = scalar_lea.sflag [#allocation4], %s2185_s30 }
 0x401   : > { %p2752_p9 = pnand %p2756_p7, %p3146_p2 }
 0x403   : > { %p2753_p10 = pneg %p2752_p9 }
 0x405   : > { %2959 = dma.done.wait (%p2753_p10), %s2186_s8, 4096  }
 0x406   : > { %2961 = vsyncadd (%p2753_p10), %s2186_s8, 4294963200  ;;  %s23_s11 = sadd.s32 1, %s3004_s11   ;;  %s4090_s23 = sld [smem:[#allocation14_spill]] }
 0x407   : > { %p20_p11 = scmp.ge.s32.totalorder %s23_s11, 6   ;;  %s4091_s7 = sld [smem:[#allocation13_spill]] }
 0x408   : > { %s4092_s30 = sld [smem:[#allocation8_spill]]  ;;  %s4096_s24 = smov %s2968_s25 }
 0x409   : > { %s4093_s8 = sld [smem:[#allocation9_spill]]  ;;  %s4097_s25 = smov %s2972_s26 }
 0x40a   : > { %s4094_s9 = sld [smem:[#allocation10_spill]]  ;;  %s4099_s27 = smov %s2980_s28 }
 0x40b   : > { %s4095_s10 = sld [smem:[#allocation11_spill]]  ;;  %s4100_s28 = smov %s2984_s29 }
 0x40c   : > { %s4098_s26 = smov %s4090_s23  ;;  %22 = sbr.rel (!%p20_p11) target bundleno = 11 (0xb), region = 96 }
 0x40d   : > { %s4101_s29 = smov %s4091_s7 }
 0x411   :  { %2192 = vsyncpa [#allocation3], 1 }
 0x412   :  { %2194 = vsyncpa [#allocation3 + $0x1], 1 }
 0x413   :  { %2195 = vsyncpa [#allocation4], 1 }
 0x414   :  { %2197 = vsyncpa [#allocation4 + $0x1], 1 }

</bundles_post_ra>
